<compile_context>
chip_gen: v7x
topology: tpu7x:2x2x1
jax: 0.10.0
libtpu: 0.0.40
codegen_flags: <defaults>
</compile_context>

<pallas_src>
import functools

import numpy as np
import jax
import jax.numpy as jnp
from jax.experimental import pallas as pl
from jax.experimental.pallas import tpu as pltpu


# ------------------------------ fused kernel --------------------------------

def _cnn_fused_kernel(x_ref, w1_ref, b1_ref, w2_ref, b2_ref, wfc_ref, bfc_ref,
                      o_ref, a1_ref, a2_ref, *, Bblk, H, W, C1, C2, NCLS):
    """One batch block per grid step; all activations stay in VMEM."""
    K, P = 5, 2
    H2, W2 = H // 2, W // 2
    H4, W4 = H // 4, W // 4

    # ---- conv1: banded im2col (5 shifted row copies) + ONE MXU matmul -------
    x = x_ref[...]                                     # (H, Bblk, W), (h,b) rows
    for ki in range(K):
        h0, h1 = max(0, P - ki), min(H, H + P - ki)    # rows with valid input
        c0 = ki * W
        if h0 > 0:                                     # vertical zero padding
            a1_ref[0:h0 * Bblk, c0:c0 + W] = jnp.zeros((h0 * Bblk, W),
                                                       jnp.float32)
        if h1 < H:
            a1_ref[h1 * Bblk:H * Bblk, c0:c0 + W] = jnp.zeros(
                ((H - h1) * Bblk, W), jnp.float32)
        a1_ref[h0 * Bblk:h1 * Bblk, c0:c0 + W] = (
            x[h0 + ki - P:h1 + ki - P].reshape((h1 - h0) * Bblk, W))
    y1 = jnp.dot(a1_ref[...], w1_ref[...], preferred_element_type=jnp.float32)
    y1 = jnp.maximum(y1 + b1_ref[...], 0.0)            # (H*Bblk, W*C1)

    # ---- maxpool1: h-pairs = adjacent row slabs, w-pairs = lane halves ------
    y1 = y1.reshape(H2, 2, Bblk, W * C1)
    r1 = jnp.maximum(y1[:, 0], y1[:, 1])               # (H2, Bblk, W*C1)
    p1 = jnp.maximum(r1[..., :W2 * C1], r1[..., W2 * C1:])   # (H2,Bblk,W2*C1)

    # ---- conv2: same banded im2col + ONE MXU matmul --------------------------
    for ki in range(K):
        h0, h1 = max(0, P - ki), min(H2, H2 + P - ki)
        c0 = ki * W2 * C1
        if h0 > 0:
            a2_ref[0:h0 * Bblk, c0:c0 + W2 * C1] = jnp.zeros(
                (h0 * Bblk, W2 * C1), jnp.float32)
        if h1 < H2:
            a2_ref[h1 * Bblk:H2 * Bblk, c0:c0 + W2 * C1] = jnp.zeros(
                ((H2 - h1) * Bblk, W2 * C1), jnp.float32)
        a2_ref[h0 * Bblk:h1 * Bblk, c0:c0 + W2 * C1] = (
            p1[h0 + ki - P:h1 + ki - P].reshape((h1 - h0) * Bblk, W2 * C1))
    y2 = jnp.dot(a2_ref[...], w2_ref[...], preferred_element_type=jnp.float32)
    y2 = jnp.maximum(y2 + b2_ref[...], 0.0)            # (H2*Bblk, W2*C2)

    # ---- maxpool2 ------------------------------------------------------------
    y2 = y2.reshape(H4, 2, Bblk, W2 * C2)
    r2 = jnp.maximum(y2[:, 0], y2[:, 1])               # (H4, Bblk, W2*C2)
    p2 = jnp.maximum(r2[..., :W4 * C2], r2[..., W4 * C2:])   # (H4,Bblk,W4*C2)

    # ---- FC: one matmul per h4 row slab (4 total), accumulated --------------
    acc = jnp.zeros((Bblk, NCLS), jnp.float32)
    for h4 in range(H4):
        acc = acc + jnp.dot(p2[h4], wfc_ref[h4],
                            preferred_element_type=jnp.float32)
    o_ref[...] = acc + bfc_ref[...]


# --------------------------- parameter preparation ---------------------------

def _conv_band_matrix(w_hwio, w_out):
    """Express a 5x5 SAME conv along W as a dense (K*W*Cin, W*Cout) matrix.

    Row (ki, jx, ci) connects input column jx / channel ci of the ki-th
    vertically shifted row copy to every output (w, co).  Output columns are
    ordered [even w | odd w] so a later 2-wide max-pool is just
    max(left lane half, right lane half).  Horizontal zero padding is folded
    in (padding columns are simply absent / zero rows)."""
    K, _, Cin, Cout = w_hwio.shape
    P = K // 2
    w_np = np.asarray(w_hwio, np.float32)
    band = np.zeros((K, w_out, Cin, w_out, Cout), np.float32)  # (ki,jx,ci,w,co)
    for ki in range(K):
        for w in range(w_out):
            for kj in range(K):
                jx = w + kj - P
                if 0 <= jx < w_out:
                    band[ki, jx, :, w, :] = w_np[ki, kj]
    order = np.concatenate([np.arange(0, w_out, 2), np.arange(1, w_out, 2)])
    band = band[:, :, :, order, :]
    return jnp.asarray(band.reshape(K * w_out * Cin, w_out * Cout))


def prepare_params(params, H=16, W=16):
    """One-time conversion of PyTorch-layout params into kernel layouts."""
    C1 = params["w1"].shape[-1]
    C2 = params["w2"].shape[-1]
    NCLS = params["wfc"].shape[-1]
    H2, W2, H4, W4 = H // 2, W // 2, H // 4, W // 4
    assert params["wfc"].shape[0] == C2 * H4 * W4
    # torch NCHW-flatten rows (c, h4, w4) -> (h4, w4*C2 + c) to match the
    # kernel's pooled-activation layout.
    wfc = jnp.asarray(params["wfc"], jnp.float32)
    wfc = wfc.reshape(C2, H4, W4, NCLS).transpose(1, 2, 0, 3)
    wfc = wfc.reshape(H4, W4 * C2, NCLS)
    return {
        "band1": _conv_band_matrix(params["w1"], W),          # (5*W, W*C1)
        "b1t": jnp.tile(jnp.asarray(params["b1"], jnp.float32),
                        W).reshape(1, W * C1),
        "band2": _conv_band_matrix(params["w2"], W2),         # (5*W2*C1, W2*C2)
        "b2t": jnp.tile(jnp.asarray(params["b2"], jnp.float32),
                        W2).reshape(1, W2 * C2),
        "wfc": wfc,                                           # (H4, W4*C2, NCLS)
        "bfc": jnp.asarray(params["bfc"], jnp.float32).reshape(1, NCLS),
    }


# --------------------------------- wrapper -----------------------------------

def cnn_forward(x_nchw, kp, *, block_b=64):
    B, Cin, H, W = x_nchw.shape
    assert Cin == 1 and H % 4 == 0 and W % 4 == 0
    C1 = kp["b1t"].shape[-1] // W
    C2 = kp["b2t"].shape[-1] // (W // 2)
    NCLS = kp["bfc"].shape[-1]
    H2 = H // 2
    H4, W4 = H // 4, W // 4

    Bblk = min(block_b, B)
    assert B % Bblk == 0 and Bblk % 8 == 0, (
        "batch must be a multiple of the batch block; block must be a "
        "multiple of 8")

    # (B, 1, H, W) -> (H, B, W): rows become (h, b)-major inside the kernel so
    # the 2x2 pools reduce over contiguous row slabs and lane halves.
    x_t = jnp.transpose(x_nchw.reshape(B, H, W).astype(jnp.float32), (1, 0, 2))

    kernel = functools.partial(_cnn_fused_kernel, Bblk=Bblk, H=H, W=W,
                               C1=C1, C2=C2, NCLS=NCLS)
    out = pl.pallas_call(
        kernel,
        out_shape=jax.ShapeDtypeStruct((B, NCLS), jnp.float32),
        grid=(B // Bblk,),
        in_specs=[
            pl.BlockSpec((H, Bblk, W), lambda i: (0, i, 0)),              # x
            pl.BlockSpec((5 * W, W * C1), lambda i: (0, 0)),              # band1
            pl.BlockSpec((1, W * C1), lambda i: (0, 0)),                  # b1
            pl.BlockSpec((5 * (W // 2) * C1, (W // 2) * C2),
                         lambda i: (0, 0)),                               # band2
            pl.BlockSpec((1, (W // 2) * C2), lambda i: (0, 0)),           # b2
            pl.BlockSpec((H4, W4 * C2, NCLS), lambda i: (0, 0, 0)),       # wfc
            pl.BlockSpec((1, NCLS), lambda i: (0, 0)),                    # bfc
        ],
        out_specs=pl.BlockSpec((Bblk, NCLS), lambda i: (i, 0)),
        scratch_shapes=[
            pltpu.VMEM((H * Bblk, 5 * W), jnp.float32),                   # conv1 im2col
            pltpu.VMEM((H2 * Bblk, 5 * (W // 2) * C1), jnp.float32),      # conv2 im2col
        ],
        compiler_params=pltpu.CompilerParams(
            dimension_semantics=("parallel",)),                           # v7x: 2 TCs
    )(x_t, kp["band1"], kp["b1t"], kp["band2"], kp["b2t"], kp["wfc"],
      kp["bfc"])
    return out


# ------------------------- init + pure-JAX reference -------------------------

def init_params(key, out_1=16, out_2=32, n_classes=10):
    k1, k2, k3, k4, k5, k6 = jax.random.split(key, 6)
    return {
        # conv weights stored HWIO (kh, kw, in_ch, out_ch)
        "w1": 0.1 * jax.random.normal(k1, (5, 5, 1, out_1), jnp.float32),
        "b1": 0.1 * jax.random.normal(k2, (out_1,), jnp.float32),
        "w2": 0.1 * jax.random.normal(k3, (5, 5, out_1, out_2), jnp.float32),
        "b2": 0.1 * jax.random.normal(k4, (out_2,), jnp.float32),
        # fc weight (in_features, out_features), rows in torch NCHW-flatten order
        "wfc": 0.1 * jax.random.normal(k5, (out_2 * 4 * 4, n_classes),
                                       jnp.float32),
        "bfc": 0.1 * jax.random.normal(k6, (n_classes,), jnp.float32),
    }


def cnn_reference(x_nchw, params):
    """Pure-JAX reference (lax.conv / reduce_window) for validation."""
    x = x_nchw.astype(jnp.float32)
    w1 = jnp.transpose(params["w1"], (3, 2, 0, 1))  # HWIO -> OIHW
    w2 = jnp.transpose(params["w2"], (3, 2, 0, 1))
    dn = ("NCHW", "OIHW", "NCHW")
    y = jax.lax.conv_general_dilated(x, w1, (1, 1), [(2, 2), (2, 2)],
                                     dimension_numbers=dn)
    y = jax.nn.relu(y + params["b1"][None, :, None, None])
    y = jax.lax.reduce_window(y, -jnp.inf, jax.lax.max,
                              (1, 1, 2, 2), (1, 1, 2, 2), "VALID")
    y = jax.lax.conv_general_dilated(y, w2, (1, 1), [(2, 2), (2, 2)],
                                     dimension_numbers=dn)
    y = jax.nn.relu(y + params["b2"][None, :, None, None])
    y = jax.lax.reduce_window(y, -jnp.inf, jax.lax.max,
                              (1, 1, 2, 2), (1, 1, 2, 2), "VALID")
    flat = y.reshape(y.shape[0], -1)
    return flat @ params["wfc"] + params["bfc"]


if __name__ == "__main__":
    key = jax.random.PRNGKey(0)
    k_x, k_p = jax.random.split(key)
    # fc1 expects out_2*4*4 features => 16x16 spatial, 1 input channel (NCHW).
    B = 16
    x = jax.random.normal(k_x, (B, 1, 16, 16), jnp.float32)
    params = init_params(k_p)
    kparams = prepare_params(params)

    fwd = jax.jit(functools.partial(cnn_forward, block_b=8))  # grid of 2 steps
    out = jax.block_until_ready(fwd(x, kparams))
    ref = jax.block_until_ready(cnn_reference(x, params))

    assert out.shape == (B, 10), out.shape
    assert jnp.allclose(out, ref, rtol=1e-4, atol=1e-4), (
        f"max abs diff {jnp.max(jnp.abs(out - ref))}")
    print("KERNEL_OK")
</pallas_src>

<mosaic_0001>
module attributes {stable_mosaic.version = 11 : i64} {
  func.func @_cnn_fused_kernel(%arg0: i32, %arg1: memref<16x8x16xf32, #tpu.memory_space<vmem>>, %arg2: memref<80x256xf32, #tpu.memory_space<vmem>>, %arg3: memref<1x256xf32, #tpu.memory_space<vmem>>, %arg4: memref<640x256xf32, #tpu.memory_space<vmem>>, %arg5: memref<1x256xf32, #tpu.memory_space<vmem>>, %arg6: memref<4x128x10xf32, #tpu.memory_space<vmem>>, %arg7: memref<1x10xf32, #tpu.memory_space<vmem>>, %arg8: memref<8x10xf32, #tpu.memory_space<vmem>>, %arg9: memref<128x80xf32, #tpu.memory_space<vmem>>, %arg10: memref<64x640xf32, #tpu.memory_space<vmem>>) attributes {dimension_semantics = [#tpu.dimension_semantics<parallel>], iteration_bounds = array<i64: 2>, scalar_prefetch = 0 : i64, scratch_operands = 2 : i64, tpu.core_type = #tpu.core_type<tc>, window_params = [{transform_indices = @transform_0, window_bounds = array<i64: 16, 8, 16>}, {pipeline_mode = #tpu.pipeline_mode<synchronous>, transform_indices = @transform_1, window_bounds = array<i64: 80, 256>}, {pipeline_mode = #tpu.pipeline_mode<synchronous>, transform_indices = @transform_2, window_bounds = array<i64: 1, 256>}, {pipeline_mode = #tpu.pipeline_mode<synchronous>, transform_indices = @transform_3, window_bounds = array<i64: 640, 256>}, {pipeline_mode = #tpu.pipeline_mode<synchronous>, transform_indices = @transform_4, window_bounds = array<i64: 1, 256>}, {pipeline_mode = #tpu.pipeline_mode<synchronous>, transform_indices = @transform_5, window_bounds = array<i64: 4, 128, 10>}, {pipeline_mode = #tpu.pipeline_mode<synchronous>, transform_indices = @transform_6, window_bounds = array<i64: 1, 10>}, {transform_indices = @transform_7, window_bounds = array<i64: 8, 10>}]} {
    %c0 = arith.constant 0 : index
    %c0_0 = arith.constant 0 : index
    %c0_1 = arith.constant 0 : index
    %0 = vector.load %arg1[%c0, %c0_0, %c0_1] : memref<16x8x16xf32, #tpu.memory_space<vmem>>, vector<16x8x16xf32>
    %cst = arith.constant 0.000000e+00 : f32
    %1 = vector.broadcast %cst : f32 to vector<16x16xf32>
    %c0_2 = arith.constant 0 : index
    %c0_3 = arith.constant 0 : index
    %2 = vector.load %arg9[%c0_2, %c0_3] : memref<128x80xf32, #tpu.memory_space<vmem>>, vector<16x16xf32>
    tpu.vector_store %arg9[%c0_2, %c0_3], %1 {strides = array<i32>} : memref<128x80xf32, #tpu.memory_space<vmem>>, vector<16x16xf32>,
    %3 = vector.extract_strided_slice %0 {offsets = [0, 0, 0], sizes = [14, 8, 16], strides = [1, 1, 1]} : vector<16x8x16xf32> to vector<14x8x16xf32>
    %4 = vector.shape_cast %3 : vector<14x8x16xf32> to vector<112x16xf32>
    %c16 = arith.constant 16 : index
    %c0_4 = arith.constant 0 : index
    %5 = vector.load %arg9[%c16, %c0_4] : memref<128x80xf32, #tpu.memory_space<vmem>>, vector<112x16xf32>
    tpu.vector_store %arg9[%c16, %c0_4], %4 {strides = array<i32>} : memref<128x80xf32, #tpu.memory_space<vmem>>, vector<112x16xf32>,
    %cst_5 = arith.constant 0.000000e+00 : f32
    %6 = vector.broadcast %cst_5 : f32 to vector<8x16xf32>
    %c0_6 = arith.constant 0 : index
    %c16_7 = arith.constant 16 : index
    %7 = vector.load %arg9[%c0_6, %c16_7] : memref<128x80xf32, #tpu.memory_space<vmem>>, vector<8x16xf32>
    tpu.vector_store %arg9[%c0_6, %c16_7], %6 {strides = array<i32>} : memref<128x80xf32, #tpu.memory_space<vmem>>, vector<8x16xf32>,
    %8 = vector.extract_strided_slice %0 {offsets = [0, 0, 0], sizes = [15, 8, 16], strides = [1, 1, 1]} : vector<16x8x16xf32> to vector<15x8x16xf32>
    %9 = vector.shape_cast %8 : vector<15x8x16xf32> to vector<120x16xf32>
    %c8 = arith.constant 8 : index
    %c16_8 = arith.constant 16 : index
    %10 = vector.load %arg9[%c8, %c16_8] : memref<128x80xf32, #tpu.memory_space<vmem>>, vector<120x16xf32>
    tpu.vector_store %arg9[%c8, %c16_8], %9 {strides = array<i32>} : memref<128x80xf32, #tpu.memory_space<vmem>>, vector<120x16xf32>,
    %11 = vector.shape_cast %0 : vector<16x8x16xf32> to vector<128x16xf32>
    %c0_9 = arith.constant 0 : index
    %c32 = arith.constant 32 : index
    %12 = vector.load %arg9[%c0_9, %c32] : memref<128x80xf32, #tpu.memory_space<vmem>>, vector<128x16xf32>
    tpu.vector_store %arg9[%c0_9, %c32], %11 {strides = array<i32>} : memref<128x80xf32, #tpu.memory_space<vmem>>, vector<128x16xf32>,
    %cst_10 = arith.constant 0.000000e+00 : f32
    %13 = vector.broadcast %cst_10 : f32 to vector<8x16xf32>
    %c120 = arith.constant 120 : index
    %c48 = arith.constant 48 : index
    %14 = vector.load %arg9[%c120, %c48] : memref<128x80xf32, #tpu.memory_space<vmem>>, vector<8x16xf32>
    tpu.vector_store %arg9[%c120, %c48], %13 {strides = array<i32>} : memref<128x80xf32, #tpu.memory_space<vmem>>, vector<8x16xf32>,
    %15 = vector.extract_strided_slice %0 {offsets = [1, 0, 0], sizes = [15, 8, 16], strides = [1, 1, 1]} : vector<16x8x16xf32> to vector<15x8x16xf32>
    %16 = vector.shape_cast %15 : vector<15x8x16xf32> to vector<120x16xf32>
    %c0_11 = arith.constant 0 : index
    %c48_12 = arith.constant 48 : index
    %17 = vector.load %arg9[%c0_11, %c48_12] : memref<128x80xf32, #tpu.memory_space<vmem>>, vector<120x16xf32>
    tpu.vector_store %arg9[%c0_11, %c48_12], %16 {strides = array<i32>} : memref<128x80xf32, #tpu.memory_space<vmem>>, vector<120x16xf32>,
    %cst_13 = arith.constant 0.000000e+00 : f32
    %18 = vector.broadcast %cst_13 : f32 to vector<16x16xf32>
    %c112 = arith.constant 112 : index
    %c64 = arith.constant 64 : index
    %19 = vector.load %arg9[%c112, %c64] : memref<128x80xf32, #tpu.memory_space<vmem>>, vector<16x16xf32>
    tpu.vector_store %arg9[%c112, %c64], %18 {strides = array<i32>} : memref<128x80xf32, #tpu.memory_space<vmem>>, vector<16x16xf32>,
    %20 = vector.extract_strided_slice %0 {offsets = [2, 0, 0], sizes = [14, 8, 16], strides = [1, 1, 1]} : vector<16x8x16xf32> to vector<14x8x16xf32>
    %21 = vector.shape_cast %20 : vector<14x8x16xf32> to vector<112x16xf32>
    %c0_14 = arith.constant 0 : index
    %c64_15 = arith.constant 64 : index
    %22 = vector.load %arg9[%c0_14, %c64_15] : memref<128x80xf32, #tpu.memory_space<vmem>>, vector<112x16xf32>
    tpu.vector_store %arg9[%c0_14, %c64_15], %21 {strides = array<i32>} : memref<128x80xf32, #tpu.memory_space<vmem>>, vector<112x16xf32>,
    %c0_16 = arith.constant 0 : index
    %c0_17 = arith.constant 0 : index
    %23 = vector.load %arg9[%c0_16, %c0_17] : memref<128x80xf32, #tpu.memory_space<vmem>>, vector<128x80xf32>
    %c0_18 = arith.constant 0 : index
    %c0_19 = arith.constant 0 : index
    %24 = vector.load %arg2[%c0_18, %c0_19] : memref<80x256xf32, #tpu.memory_space<vmem>>, vector<80x256xf32>
    %cst_20 = arith.constant dense<0.000000e+00> : vector<128x256xf32>
    %25 = tpu.matmul %23, %24, %cst_20 {dimension_numbers = #tpu.dot_dimension_numbers<[1], [0], [0], [1], [0, 0, 1, 1], [], []>} : vector<128x80xf32>, vector<80x256xf32>, vector<128x256xf32> -> vector<128x256xf32>
    %c0_21 = arith.constant 0 : index
    %c0_22 = arith.constant 0 : index
    %26 = vector.load %arg3[%c0_21, %c0_22] : memref<1x256xf32, #tpu.memory_space<vmem>>, vector<1x256xf32>
    %27 = vector.broadcast %26 : vector<1x256xf32> to vector<128x256xf32>
    %28 = arith.addf %25, %27 : vector<128x256xf32>
    %cst_23 = arith.constant 0.000000e+00 : f32
    %29 = vector.broadcast %cst_23 : f32 to vector<128x256xf32>
    %30 = arith.maximumf %28, %29 : vector<128x256xf32>
    %31 = vector.shape_cast %30 : vector<128x256xf32> to vector<8x2x8x256xf32>
    %32 = vector.extract_strided_slice %31 {offsets = [0, 0, 0, 0], sizes = [8, 1, 8, 256], strides = [1, 1, 1, 1]} : vector<8x2x8x256xf32> to vector<8x1x8x256xf32>
    %33 = vector.shape_cast %32 : vector<8x1x8x256xf32> to vector<8x8x256xf32>
    %34 = vector.extract_strided_slice %31 {offsets = [0, 1, 0, 0], sizes = [8, 1, 8, 256], strides = [1, 1, 1, 1]} : vector<8x2x8x256xf32> to vector<8x1x8x256xf32>
    %35 = vector.shape_cast %34 : vector<8x1x8x256xf32> to vector<8x8x256xf32>
    %36 = arith.maximumf %33, %35 : vector<8x8x256xf32>
    %37 = vector.extract_strided_slice %36 {offsets = [0, 0, 0], sizes = [8, 8, 128], strides = [1, 1, 1]} : vector<8x8x256xf32> to vector<8x8x128xf32>
    %38 = vector.extract_strided_slice %36 {offsets = [0, 0, 128], sizes = [8, 8, 128], strides = [1, 1, 1]} : vector<8x8x256xf32> to vector<8x8x128xf32>
    %39 = arith.maximumf %37, %38 : vector<8x8x128xf32>
    %cst_24 = arith.constant 0.000000e+00 : f32
    %40 = vector.broadcast %cst_24 : f32 to vector<16x128xf32>
    %c0_25 = arith.constant 0 : index
    %c0_26 = arith.constant 0 : index
    %41 = vector.load %arg10[%c0_25, %c0_26] : memref<64x640xf32, #tpu.memory_space<vmem>>, vector<16x128xf32>
    tpu.vector_store %arg10[%c0_25, %c0_26], %40 {strides = array<i32>} : memref<64x640xf32, #tpu.memory_space<vmem>>, vector<16x128xf32>,
    %42 = vector.extract_strided_slice %39 {offsets = [0, 0, 0], sizes = [6, 8, 128], strides = [1, 1, 1]} : vector<8x8x128xf32> to vector<6x8x128xf32>
    %43 = vector.shape_cast %42 : vector<6x8x128xf32> to vector<48x128xf32>
    %c16_27 = arith.constant 16 : index
    %c0_28 = arith.constant 0 : index
    %44 = vector.load %arg10[%c16_27, %c0_28] : memref<64x640xf32, #tpu.memory_space<vmem>>, vector<48x128xf32>
    tpu.vector_store %arg10[%c16_27, %c0_28], %43 {strides = array<i32>} : memref<64x640xf32, #tpu.memory_space<vmem>>, vector<48x128xf32>,
    %cst_29 = arith.constant 0.000000e+00 : f32
    %45 = vector.broadcast %cst_29 : f32 to vector<8x128xf32>
    %c0_30 = arith.constant 0 : index
    %c128 = arith.constant 128 : index
    %46 = vector.load %arg10[%c0_30, %c128] : memref<64x640xf32, #tpu.memory_space<vmem>>, vector<8x128xf32>
    tpu.vector_store %arg10[%c0_30, %c128], %45 {strides = array<i32>} : memref<64x640xf32, #tpu.memory_space<vmem>>, vector<8x128xf32>,
    %47 = vector.extract_strided_slice %39 {offsets = [0, 0, 0], sizes = [7, 8, 128], strides = [1, 1, 1]} : vector<8x8x128xf32> to vector<7x8x128xf32>
    %48 = vector.shape_cast %47 : vector<7x8x128xf32> to vector<56x128xf32>
    %c8_31 = arith.constant 8 : index
    %c128_32 = arith.constant 128 : index
    %49 = vector.load %arg10[%c8_31, %c128_32] : memref<64x640xf32, #tpu.memory_space<vmem>>, vector<56x128xf32>
    tpu.vector_store %arg10[%c8_31, %c128_32], %48 {strides = array<i32>} : memref<64x640xf32, #tpu.memory_space<vmem>>, vector<56x128xf32>,
    %50 = vector.shape_cast %39 : vector<8x8x128xf32> to vector<64x128xf32>
    %c0_33 = arith.constant 0 : index
    %c256 = arith.constant 256 : index
    %51 = vector.load %arg10[%c0_33, %c256] : memref<64x640xf32, #tpu.memory_space<vmem>>, vector<64x128xf32>
    tpu.vector_store %arg10[%c0_33, %c256], %50 {strides = array<i32>} : memref<64x640xf32, #tpu.memory_space<vmem>>, vector<64x128xf32>,
    %cst_34 = arith.constant 0.000000e+00 : f32
    %52 = vector.broadcast %cst_34 : f32 to vector<8x128xf32>
    %c56 = arith.constant 56 : index
    %c384 = arith.constant 384 : index
    %53 = vector.load %arg10[%c56, %c384] : memref<64x640xf32, #tpu.memory_space<vmem>>, vector<8x128xf32>
    tpu.vector_store %arg10[%c56, %c384], %52 {strides = array<i32>} : memref<64x640xf32, #tpu.memory_space<vmem>>, vector<8x128xf32>,
    %54 = vector.extract_strided_slice %39 {offsets = [1, 0, 0], sizes = [7, 8, 128], strides = [1, 1, 1]} : vector<8x8x128xf32> to vector<7x8x128xf32>
    %55 = vector.shape_cast %54 : vector<7x8x128xf32> to vector<56x128xf32>
    %c0_35 = arith.constant 0 : index
    %c384_36 = arith.constant 384 : index
    %56 = vector.load %arg10[%c0_35, %c384_36] : memref<64x640xf32, #tpu.memory_space<vmem>>, vector<56x128xf32>
    tpu.vector_store %arg10[%c0_35, %c384_36], %55 {strides = array<i32>} : memref<64x640xf32, #tpu.memory_space<vmem>>, vector<56x128xf32>,
    %cst_37 = arith.constant 0.000000e+00 : f32
    %57 = vector.broadcast %cst_37 : f32 to vector<16x128xf32>
    %c48_38 = arith.constant 48 : index
    %c512 = arith.constant 512 : index
    %58 = vector.load %arg10[%c48_38, %c512] : memref<64x640xf32, #tpu.memory_space<vmem>>, vector<16x128xf32>
    tpu.vector_store %arg10[%c48_38, %c512], %57 {strides = array<i32>} : memref<64x640xf32, #tpu.memory_space<vmem>>, vector<16x128xf32>,
    %59 = vector.extract_strided_slice %39 {offsets = [2, 0, 0], sizes = [6, 8, 128], strides = [1, 1, 1]} : vector<8x8x128xf32> to vector<6x8x128xf32>
    %60 = vector.shape_cast %59 : vector<6x8x128xf32> to vector<48x128xf32>
    %c0_39 = arith.constant 0 : index
    %c512_40 = arith.constant 512 : index
    %61 = vector.load %arg10[%c0_39, %c512_40] : memref<64x640xf32, #tpu.memory_space<vmem>>, vector<48x128xf32>
    tpu.vector_store %arg10[%c0_39, %c512_40], %60 {strides = array<i32>} : memref<64x640xf32, #tpu.memory_space<vmem>>, vector<48x128xf32>,
    %c0_41 = arith.constant 0 : index
    %c0_42 = arith.constant 0 : index
    %62 = vector.load %arg10[%c0_41, %c0_42] : memref<64x640xf32, #tpu.memory_space<vmem>>, vector<64x640xf32>
    %c0_43 = arith.constant 0 : index
    %c0_44 = arith.constant 0 : index
    %63 = vector.load %arg4[%c0_43, %c0_44] : memref<640x256xf32, #tpu.memory_space<vmem>>, vector<640x256xf32>
    %cst_45 = arith.constant dense<0.000000e+00> : vector<64x256xf32>
    %64 = tpu.matmul %62, %63, %cst_45 {dimension_numbers = #tpu.dot_dimension_numbers<[1], [0], [0], [1], [0, 0, 1, 1], [], []>} : vector<64x640xf32>, vector<640x256xf32>, vector<64x256xf32> -> vector<64x256xf32>
    %c0_46 = arith.constant 0 : index
    %c0_47 = arith.constant 0 : index
    %65 = vector.load %arg5[%c0_46, %c0_47] : memref<1x256xf32, #tpu.memory_space<vmem>>, vector<1x256xf32>
    %66 = vector.broadcast %65 : vector<1x256xf32> to vector<64x256xf32>
    %67 = arith.addf %64, %66 : vector<64x256xf32>
    %cst_48 = arith.constant 0.000000e+00 : f32
    %68 = vector.broadcast %cst_48 : f32 to vector<64x256xf32>
    %69 = arith.maximumf %67, %68 : vector<64x256xf32>
    %70 = vector.shape_cast %69 : vector<64x256xf32> to vector<4x2x8x256xf32>
    %71 = vector.extract_strided_slice %70 {offsets = [0, 0, 0, 0], sizes = [4, 1, 8, 256], strides = [1, 1, 1, 1]} : vector<4x2x8x256xf32> to vector<4x1x8x256xf32>
    %72 = vector.shape_cast %71 : vector<4x1x8x256xf32> to vector<4x8x256xf32>
    %73 = vector.extract_strided_slice %70 {offsets = [0, 1, 0, 0], sizes = [4, 1, 8, 256], strides = [1, 1, 1, 1]} : vector<4x2x8x256xf32> to vector<4x1x8x256xf32>
    %74 = vector.shape_cast %73 : vector<4x1x8x256xf32> to vector<4x8x256xf32>
    %75 = arith.maximumf %72, %74 : vector<4x8x256xf32>
    %76 = vector.extract_strided_slice %75 {offsets = [0, 0, 0], sizes = [4, 8, 128], strides = [1, 1, 1]} : vector<4x8x256xf32> to vector<4x8x128xf32>
    %77 = vector.extract_strided_slice %75 {offsets = [0, 0, 128], sizes = [4, 8, 128], strides = [1, 1, 1]} : vector<4x8x256xf32> to vector<4x8x128xf32>
    %78 = arith.maximumf %76, %77 : vector<4x8x128xf32>
    %cst_49 = arith.constant 0.000000e+00 : f32
    %79 = vector.broadcast %cst_49 : f32 to vector<8x10xf32>
    %80 = vector.extract_strided_slice %78 {offsets = [0, 0, 0], sizes = [1, 8, 128], strides = [1, 1, 1]} : vector<4x8x128xf32> to vector<1x8x128xf32>
    %81 = vector.shape_cast %80 : vector<1x8x128xf32> to vector<8x128xf32>
    %c0_50 = arith.constant 0 : index
    %c0_51 = arith.constant 0 : index
    %c0_52 = arith.constant 0 : index
    %82 = vector.load %arg6[%c0_50, %c0_51, %c0_52] : memref<4x128x10xf32, #tpu.memory_space<vmem>>, vector<1x128x10xf32>
    %83 = vector.shape_cast %82 : vector<1x128x10xf32> to vector<128x10xf32>
    %cst_53 = arith.constant dense<0.000000e+00> : vector<8x10xf32>
    %84 = tpu.matmul %81, %83, %cst_53 {dimension_numbers = #tpu.dot_dimension_numbers<[1], [0], [0], [1], [0, 0, 1, 1], [], []>} : vector<8x128xf32>, vector<128x10xf32>, vector<8x10xf32> -> vector<8x10xf32>
    %85 = arith.addf %79, %84 : vector<8x10xf32>
    %86 = vector.extract_strided_slice %78 {offsets = [1, 0, 0], sizes = [1, 8, 128], strides = [1, 1, 1]} : vector<4x8x128xf32> to vector<1x8x128xf32>
    %87 = vector.shape_cast %86 : vector<1x8x128xf32> to vector<8x128xf32>
    %c1 = arith.constant 1 : index
    %c0_54 = arith.constant 0 : index
    %c0_55 = arith.constant 0 : index
    %88 = vector.load %arg6[%c1, %c0_54, %c0_55] : memref<4x128x10xf32, #tpu.memory_space<vmem>>, vector<1x128x10xf32>
    %89 = vector.shape_cast %88 : vector<1x128x10xf32> to vector<128x10xf32>
    %cst_56 = arith.constant dense<0.000000e+00> : vector<8x10xf32>
    %90 = tpu.matmul %87, %89, %cst_56 {dimension_numbers = #tpu.dot_dimension_numbers<[1], [0], [0], [1], [0, 0, 1, 1], [], []>} : vector<8x128xf32>, vector<128x10xf32>, vector<8x10xf32> -> vector<8x10xf32>
    %91 = arith.addf %85, %90 : vector<8x10xf32>
    %92 = vector.extract_strided_slice %78 {offsets = [2, 0, 0], sizes = [1, 8, 128], strides = [1, 1, 1]} : vector<4x8x128xf32> to vector<1x8x128xf32>
    %93 = vector.shape_cast %92 : vector<1x8x128xf32> to vector<8x128xf32>
    %c2 = arith.constant 2 : index
    %c0_57 = arith.constant 0 : index
    %c0_58 = arith.constant 0 : index
    %94 = vector.load %arg6[%c2, %c0_57, %c0_58] : memref<4x128x10xf32, #tpu.memory_space<vmem>>, vector<1x128x10xf32>
    %95 = vector.shape_cast %94 : vector<1x128x10xf32> to vector<128x10xf32>
    %cst_59 = arith.constant dense<0.000000e+00> : vector<8x10xf32>
    %96 = tpu.matmul %93, %95, %cst_59 {dimension_numbers = #tpu.dot_dimension_numbers<[1], [0], [0], [1], [0, 0, 1, 1], [], []>} : vector<8x128xf32>, vector<128x10xf32>, vector<8x10xf32> -> vector<8x10xf32>
    %97 = arith.addf %91, %96 : vector<8x10xf32>
    %98 = vector.extract_strided_slice %78 {offsets = [3, 0, 0], sizes = [1, 8, 128], strides = [1, 1, 1]} : vector<4x8x128xf32> to vector<1x8x128xf32>
    %99 = vector.shape_cast %98 : vector<1x8x128xf32> to vector<8x128xf32>
    %c3 = arith.constant 3 : index
    %c0_60 = arith.constant 0 : index
    %c0_61 = arith.constant 0 : index
    %100 = vector.load %arg6[%c3, %c0_60, %c0_61] : memref<4x128x10xf32, #tpu.memory_space<vmem>>, vector<1x128x10xf32>
    %101 = vector.shape_cast %100 : vector<1x128x10xf32> to vector<128x10xf32>
    %cst_62 = arith.constant dense<0.000000e+00> : vector<8x10xf32>
    %102 = tpu.matmul %99, %101, %cst_62 {dimension_numbers = #tpu.dot_dimension_numbers<[1], [0], [0], [1], [0, 0, 1, 1], [], []>} : vector<8x128xf32>, vector<128x10xf32>, vector<8x10xf32> -> vector<8x10xf32>
    %103 = arith.addf %97, %102 : vector<8x10xf32>
    %c0_63 = arith.constant 0 : index
    %c0_64 = arith.constant 0 : index
    %104 = vector.load %arg7[%c0_63, %c0_64] : memref<1x10xf32, #tpu.memory_space<vmem>>, vector<1x10xf32>
    %105 = vector.broadcast %104 : vector<1x10xf32> to vector<8x10xf32>
    %106 = arith.addf %103, %105 : vector<8x10xf32>
    %c0_65 = arith.constant 0 : index
    %c0_66 = arith.constant 0 : index
    %107 = vector.load %arg8[%c0_65, %c0_66] : memref<8x10xf32, #tpu.memory_space<vmem>>, vector<8x10xf32>
    tpu.vector_store %arg8[%c0_65, %c0_66], %106 {strides = array<i32>} : memref<8x10xf32, #tpu.memory_space<vmem>>, vector<8x10xf32>,
    return
  }
  func.func @transform_0(%arg0: i32) -> (i32, i32, i32) {
    %c0_i32 = arith.constant 0 : i32
    %c0_i32_0 = arith.constant 0 : i32
    %c0_i32_1 = arith.constant 0 : i32
    return %c0_i32, %arg0, %c0_i32_0 : i32, i32, i32
  }
  func.func @transform_1(%arg0: i32) -> (i32, i32) {
    %c0_i32 = arith.constant 0 : i32
    %c0_i32_0 = arith.constant 0 : i32
    %c0_i32_1 = arith.constant 0 : i32
    return %c0_i32, %c0_i32_0 : i32, i32
  }
  func.func @transform_2(%arg0: i32) -> (i32, i32) {
    %c0_i32 = arith.constant 0 : i32
    %c0_i32_0 = arith.constant 0 : i32
    %c0_i32_1 = arith.constant 0 : i32
    return %c0_i32, %c0_i32_0 : i32, i32
  }
  func.func @transform_3(%arg0: i32) -> (i32, i32) {
    %c0_i32 = arith.constant 0 : i32
    %c0_i32_0 = arith.constant 0 : i32
    %c0_i32_1 = arith.constant 0 : i32
    return %c0_i32, %c0_i32_0 : i32, i32
  }
  func.func @transform_4(%arg0: i32) -> (i32, i32) {
    %c0_i32 = arith.constant 0 : i32
    %c0_i32_0 = arith.constant 0 : i32
    %c0_i32_1 = arith.constant 0 : i32
    return %c0_i32, %c0_i32_0 : i32, i32
  }
  func.func @transform_5(%arg0: i32) -> (i32, i32, i32) {
    %c0_i32 = arith.constant 0 : i32
    %c0_i32_0 = arith.constant 0 : i32
    %c0_i32_1 = arith.constant 0 : i32
    %c0_i32_2 = arith.constant 0 : i32
    return %c0_i32, %c0_i32_0, %c0_i32_1 : i32, i32, i32
  }
  func.func @transform_6(%arg0: i32) -> (i32, i32) {
    %c0_i32 = arith.constant 0 : i32
    %c0_i32_0 = arith.constant 0 : i32
    %c0_i32_1 = arith.constant 0 : i32
    return %c0_i32, %c0_i32_0 : i32, i32
  }
  func.func @transform_7(%arg0: i32) -> (i32, i32) {
    %c0_i32 = arith.constant 0 : i32
    %c0_i32_0 = arith.constant 0 : i32
    return %arg0, %c0_i32 : i32, i32
  }
}

</mosaic_0001>

<bundles_post_ra>
// kernel: cnn_forward.1
= control target key start
LH: loop header
LB: loop body
LE: loop exit
PB: predicated region body
PF: predicated region fallthrough
CT: control target
= control target key end

     0   :  { %12 = vsyncpa [#allocation6], 0  ;;  %s3792_s0 = inlined_call_operand.vmem [shape: f32[16,16,16], index: 0, kind: input, shape index: {}]   ;;  %s3793_s1 = inlined_call_operand.vmem [shape: f32[80,256], index: 1, kind: input, shape index: {}]   ;;  %s3794_s2 = inlined_call_operand.vmem [shape: f32[1,256], index: 2, kind: input, shape index: {}]   ;;  %s3795_s3 = inlined_call_operand.hbm [shape: f32[640,256], index: 3, kind: input, shape index: {}]   ;;  %s3796_s4 = inlined_call_operand.vmem [shape: f32[1,256], index: 4, kind: input, shape index: {}]   ;;  %s3797_s5 = inlined_call_operand.vmem [shape: f32[4,128,10], index: 5, kind: input, shape index: {}]   ;;  %s3798_s6 = inlined_call_operand.vmem [shape: f32[1,10], index: 6, kind: input, shape index: {}]   ;;  %s3799_s7 = inlined_call_operand.hbm [shape: f32[16,10], index: 7, kind: output, shape index: {}]  }
   0x1   :  { %13 = vsyncpa [#allocation7], 0 }
   0x2   :  { %15 = vsyncpa [#allocation7 + $0x1], 0  ;;  %s2883_s24 = smov 0   ;;  %s2885_s25 = smov 0  }
   0x3   :  { %s2887_s26 = smov 0   ;;  %s2889_s27 = smov 0  }
   0x4 LB: > { %s2904_s28 = sadd.s32 4294967295, %s2830_s27   ;;  %s2066_s29 = sadd.s32 4294967294, %s2830_s27   ;;  %s2830_s27 = sphi %s2889_s27, %s3826_s27   ;;  %s2826_s26 = sphi %s2887_s26, %s3825_s26   ;;  %s2822_s25 = sphi %s2885_s25, %s3824_s25   ;;  %s2818_s24 = sphi %s2883_s24, %s3823_s24  }
   0x5   : > { %s2908_s30 = sadd.s32 1, %s2830_s27   ;;  %s28_s8 = sadd.s32 1, %s2826_s26 }
   0x6   : > { %s25_s9 = ssub.s32 %s2830_s27, %s2908_s30  ;;  %p35_p0 = scmp.ne.s32.totalorder %s2826_s26, %s2822_s25 }
   0x7   : > { %p26_p1 = scmp.eq.s32.totalorder %s25_s9, 0  ;;  %p36_p2 = scmp.eq.s32.totalorder %s2830_s27, 0 }
   0x8   : > { %p191_p3 = scmp.eq.s32.totalorder %s2904_s28, 1  ;;  %p196_p4 = scmp.ne.s32.totalorder %s2822_s25, %s2818_s24 }
   0x9   : > { %s2920_s10 = scalar_select %p26_p1, %s2826_s26, %s28_s8  }
   0xa   : > { %p2922_p5 = por %p36_p2, %p35_p0  ;;  %p2926_p6 = por %p191_p3, %p35_p0 }
   0xb   : > { %p197_p7 = scmp.eq.s32.totalorder %s2066_s29, 1  ;;  %p2067_p8 = scmp.ge.s32.totalorder %s2830_s27, 1 }
   0xc   : > { %s3809_s11 = scalar_select %p2922_p5, 1, 0 }
   0xd   : > { %s3810_s12 = scalar_select %p2926_p6, 1, 0 }
   0xe   : > { %p204_p9 = scmp.lt.s32.totalorder %s2830_s27, 3  ;;  %p2932_p10 = por %p197_p7, %p196_p4 }
   0xf   : > { %p3800_p11 = scmp.eq.s32.totalorder %s2904_s28, 0  ;;  %s2832_s15 = smov [#allocation5]  }
  0x10   : > { %s3811_s13 = scalar_select %p2932_p10, 1, 0 }
  0x11   : > { %p2937_p12 = pnand %p2067_p8, %p204_p9  ;;  %s222_s16 = sshll.u32 %s2832_s15, 4  ;;  %s223_s16 = int_to_ptr.vmem [resolvable:$true] %s222_s16 }
  0x12   : > { %s2736_s20 = scalar_lea.hbm %s3795_s3, 20480 }
  0x13   : > { %s3812_s14 = scalar_select %p2937_p12, 1, 0 }
  0x14   : > { %p2683_p13 = pneg %p2937_p12  ;;  %p2737_p1 = scmp.ne.s32.totalorder %s3795_s3, %s2736_s20 }
  0x15   : > { %p2743_p7 = scmp.lt.u32.totalorder %s2736_s20, %s3795_s3 }
  0x16   : > { %p2945_p0 = pnand %p3800_p11, %p2683_p13 }
  0x18   : > { %p2738_p2 = pneg %p2945_p0 }
  0x1a   : > { %p2739_p3 = pnand %p2738_p2, %p2737_p1 }
  0x1c   : > { %p2740_p4 = pneg %p2739_p3 }
  0x1e   : > { %p2745_p8 = pnand %p2743_p7, %p2740_p4 }
  0x20   : > { %2748 = shalt.err (!%p2745_p8)
}
  0x21   : > { %s2749_s8 = scalar_lea.vmem %s223_s16, 20480  ;;  %p2757_p10 = scmp.lt.s32.totalorder %s223_s16, %s223_s16 }
  0x22   : > { %p2750_p9 = scmp.ne.s32.totalorder %s223_s16, %s2749_s8  ;;  %p2758_p6 = scmp.lt.s32.totalorder %s2749_s8, %s2749_s8 }
  0x24   : > { %p2752_p13 = pnand %p2750_p9, %p2738_p2  ;;  %p2759_p12 = por %p2758_p6, %p2757_p10 }
  0x26   : > { %p2753_p11 = pneg %p2752_p13 }
  0x28   : > { %p2760_p5 = pnand %p2759_p12, %p2753_p11 }
  0x2a   : > { %2763 = shalt.err (!%p2760_p5)
}
  0x2b   : > { %s2833_s9 = smov 256   ;;  %s2834_s15 = smov 16  }
  0x2c   : > { %2686 = dma.hbm_to_vmem [thread:$0]  (!%p2945_p0), %s3795_s3, 20480, %s223_s16, [#allocation6], %s2833_s9, %s2833_s9, %s2834_s15  }
  0x2d   : > { %p2069_p1 = scmp.ge.s32.totalorder %s2830_s27, 2 }
  0x2e   : > { %p3814_p2 = scmp.ne.s32.totalorder (!%p2069_p1), %s3809_s11, 0 }
  0x2f   : > { %241 = sbr.rel (%p2069_p1) target bundleno = 66 (0x42), region = 40 }
  0x36   : > { %244 = sbr.rel (!%p3814_p2) target bundleno = 66 (0x42), region = 44  ;;  %s246_s20 = sand.u32 (%p3814_p2), 1, %s2826_s26  }
  0x37   : > { %s2071_s21 = sshll.u32 (%p3814_p2), %s2830_s27, 3  ;;  %s2070_s22 = sshll.u32 (%p3814_p2), %s246_s20, 7 }
  0x38   : > { %s2975_s17 = scalar_lea.vmem (%p3814_p2), %s3792_s0, %s2071_s21  ;;  %s248_s11 = scalar_lea.vmem (%p3814_p2), [#allocation4], %s2070_s22 }
  0x39   : > { %v308_v0 = vld [vmem:[%s2975_s17] sm:$0xff] (%p3814_p2)  ;;  %v310_v1 = vld [vmem:[%s2975_s17 + $0x10] sm:$0xff] (%p3814_p2) }
  0x3a   : > { %v312_v2 = vld [vmem:[%s2975_s17 + $0x20] sm:$0xff] (%p3814_p2)  ;;  %309 = vst [vmem:[%s248_s11] sm:$0xff] (%p3814_p2), %v308_v0  ;;  %311 = vst [vmem:[%s248_s11 + $0x8] sm:$0xff] (%p3814_p2), %v310_v1  ;;  %v314_v3 = vld [vmem:[%s2975_s17 + $0x30] sm:$0xff] (%p3814_p2) }
  0x3b   : > { %313 = vst [vmem:[%s248_s11 + $0x10] sm:$0xff] (%p3814_p2), %v312_v2  ;;  %v316_v4 = vld [vmem:[%s2975_s17 + $0x40] sm:$0xff] (%p3814_p2)  ;;  %v318_v5 = vld [vmem:[%s2975_s17 + $0x50] sm:$0xff] (%p3814_p2)  ;;  %315 = vst [vmem:[%s248_s11 + $0x18] sm:$0xff] (%p3814_p2), %v314_v3 }
  0x3c   : > { %317 = vst [vmem:[%s248_s11 + $0x20] sm:$0xff] (%p3814_p2), %v316_v4  ;;  %319 = vst [vmem:[%s248_s11 + $0x28] sm:$0xff] (%p3814_p2), %v318_v5  ;;  %v320_v6 = vld [vmem:[%s2975_s17 + $0x60] sm:$0xff] (%p3814_p2)  ;;  %v322_v7 = vld [vmem:[%s2975_s17 + $0x70] sm:$0xff] (%p3814_p2) }
  0x3d   : > { %v324_v8 = vld [vmem:[%s2975_s17 + $0x80] sm:$0xff]  ;;  %321 = vst [vmem:[%s248_s11 + $0x30] sm:$0xff] %v320_v6  ;;  %323 = vst [vmem:[%s248_s11 + $0x38] sm:$0xff] %v322_v7  ;;  %v326_v9 = vld [vmem:[%s2975_s17 + $0x90] sm:$0xff] }
  0x3e   : > { %325 = vst [vmem:[%s248_s11 + $0x40] sm:$0xff] %v324_v8  ;;  %v328_v10 = vld [vmem:[%s2975_s17 + $0xa0] sm:$0xff]  ;;  %v330_v11 = vld [vmem:[%s2975_s17 + $0xb0] sm:$0xff]  ;;  %327 = vst [vmem:[%s248_s11 + $0x48] sm:$0xff] %v326_v9 }
  0x3f   : > { %329 = vst [vmem:[%s248_s11 + $0x50] sm:$0xff] %v328_v10  ;;  %331 = vst [vmem:[%s248_s11 + $0x58] sm:$0xff] %v330_v11  ;;  %v332_v12 = vld [vmem:[%s2975_s17 + $0xc0] sm:$0xff]  ;;  %v334_v13 = vld [vmem:[%s2975_s17 + $0xd0] sm:$0xff] }
  0x40   : > { %v336_v14 = vld [vmem:[%s2975_s17 + $0xe0] sm:$0xff]  ;;  %333 = vst [vmem:[%s248_s11 + $0x60] sm:$0xff] %v332_v12  ;;  %335 = vst [vmem:[%s248_s11 + $0x68] sm:$0xff] %v334_v13  ;;  %v338_v15 = vld [vmem:[%s2975_s17 + $0xf0] sm:$0xff] }
  0x41   : > { %337 = vst [vmem:[%s248_s11 + $0x70] sm:$0xff] %v336_v14  ;;  %339 = vst [vmem:[%s248_s11 + $0x78] sm:$0xff] %v338_v15 }
  0x42 PF: > { %p3815_p5 = scmp.ne.s32.totalorder %s3812_s14, 0 }
  0x43   : > { %s2996_s16 = sand.u32 (!%p3815_p5), 1, %s2822_s25   ;;  %p3816_p6 = scmp.eq.s32.totalorder (!%p3815_p5), %s2904_s28, 0 }
  0x44   : > { %348 = sbr.rel (%p3815_p5) target bundleno = 1126 (0x466), region = 82  ;;  %s2073_s8 = sshll.u32 (!%p3815_p5), %s2996_s16, 7 }
  0x45   : > { %s2999_s9 = scalar_lea.vmem (!%p3815_p5), [#allocation4], %s2073_s8 }
  0x4b   : > { %2809 = dma.done.wait (%p3816_p6), [#allocation6], 20480   ;;  %p3817_p10 = pmov %p3816_p6 }
  0x4c   : > { %vm402_vm0 = vcmask 130048   ;;  %v2835_v16 = vmov 0.0   ;;  %vm419_vm1 = vcmask 261248   ;;  %v386_v17 = vld [vmem:[%s2999_s9] sm:$0xff]  ;;  %v3015_v18 = vld [vmem:[%s2999_s9 + $0x10] sm:$0xff]  ;;  %v387_v19 = vld [vmem:[%s2999_s9 + $0x8] sm:$0xff] }
  0x4d   : > { %2811 = vsyncadd (%p3817_p10), [#allocation6], 4294946816  ;;  %403 = vst.msk [vmem:[#allocation2] sm:$0xff] %vm402_vm0, %v2835_v16  ;;  %844 = vmatprep.mubr.f32.mxu0 %v2835_v16  ;;  %1313 = vmatprep.mubr.f32.mxu1 %v2835_v16  ;;  %s2836_s14 = smov 32   ;;  %s3805_s15 = smov 64   ;;  %v3026_v20 = vld [vmem:[%s2999_s9 + $0x18] sm:$0xff] }
  0x4e   : > { %404 = vst.msk [vmem:[#allocation2 + $0x8] sm:$0xff] %vm402_vm0, %v2835_v16  ;;  %497 = vrot.lane.b32.xlu0 %v386_v17, %s2836_s14  ;;  %405 = vst.msk [vmem:[#allocation2 + $0x10] sm:$0xff] %vm402_vm0, %v386_v17  ;;  %627 = vrot.lane.b32.xlu1 %v3015_v18, %s3805_s15  ;;  %v3029_v21 = vld [vmem:[%s2999_s9 + $0x20] sm:$0xff]  ;;  %v3036_v22 = vld [vmem:[%s2999_s9 + $0x28] sm:$0xff]  ;;  %s3807_s18 = smov 48   ;;  %s3803_s19 = smov 16  }
  0x4f   : > { %420 = vst.msk [vmem:[#allocation2] sm:$0xff] %vm419_vm1, %v2835_v16  ;;  %v3039_v23 = vld [vmem:[%s2999_s9 + $0x30] sm:$0xff]  ;;  %v3042_v24 = vld [vmem:[%s2999_s9 + $0x38] sm:$0xff]  ;;  %v3051_v25 = vld [vmem:[%s2999_s9 + $0x40] sm:$0xff]  ;;  %s3818_s17 = smov 48   ;;  %s3819_s23 = smov 64  }
  0x50   : > { %407 = vst.msk [vmem:[#allocation2 + $0x20] sm:$0xff] %vm402_vm0, %v3015_v18  ;;  %406 = vst.msk [vmem:[#allocation2 + $0x18] sm:$0xff] %vm402_vm0, %v387_v19  ;;  %v3054_v26 = vld [vmem:[%s2999_s9 + $0x48] sm:$0xff]  ;;  %v3057_v27 = vld [vmem:[%s2999_s9 + $0x50] sm:$0xff]  ;;  %s3820_s29 = smov 16   ;;  %vm545_vm2 = vcmask 392448  }
  0x51   : > { %408 = vst.msk [vmem:[#allocation2 + $0x28] sm:$0xff] %vm402_vm0, %v3026_v20  ;;  %409 = vst.msk [vmem:[#allocation2 + $0x30] sm:$0xff] %vm402_vm0, %v3029_v21  ;;  %v3066_v28 = vld [vmem:[%s2999_s9 + $0x58] sm:$0xff]  ;;  %v3069_v29 = vld [vmem:[%s2999_s9 + $0x60] sm:$0xff]  ;;  %vm562_vm3 = vcmask 523648   ;;  %vm624_vm4 = vcmask 654848  }
  0x52   : > { %410 = vst.msk [vmem:[#allocation2 + $0x38] sm:$0xff] %vm402_vm0, %v3036_v22  ;;  %411 = vst.msk [vmem:[#allocation2 + $0x40] sm:$0xff] %vm402_vm0, %v3039_v23  ;;  %v3072_v30 = vld [vmem:[%s2999_s9 + $0x68] sm:$0xff]  ;;  %564 = vrot.lane.b32.xlu0 %v387_v19, %s3807_s18  ;;  %436 = vrot.lane.b32.xlu1 %v386_v17, %s3803_s19  ;;  %v702_v32 = vld [vmem:[%s3793_s1 + $0x18] sm:$0xff]  ;;  %vm731_vm5 = vcmask 654336   ;;  %vm2841_vm6 = vmmov 0  }
  0x53   : > { %412 = vst.msk [vmem:[#allocation2 + $0x48] sm:$0xff] %vm402_vm0, %v3042_v24  ;;  %413 = vst.msk [vmem:[#allocation2 + $0x50] sm:$0xff] %vm402_vm0, %v3051_v25  ;;  %v700_v31 = vld [vmem:[%s3793_s1 + $0x8] sm:$0xff]  ;;  %v699_v33 = vld [vmem:[%s3793_s1] sm:$0xff]  ;;  %s2142_s15 = sshll.u32 %s2904_s28, 7  ;;  %vm1973_vm7 = vcmask 80896  }
  0x54   : > { %414 = vst.msk [vmem:[#allocation2 + $0x58] sm:$0xff] %vm402_vm0, %v3054_v26  ;;  %415 = vst.msk [vmem:[#allocation2 + $0x60] sm:$0xff] %vm402_vm0, %v3057_v27  ;;  %v2353_v34 = vpack.c.bf16 %v702_v32, %v700_v31  ;;  %v701_v35 = vld [vmem:[%s3793_s1 + $0x10] sm:$0xff]  ;;  %v704_v36 = vld [vmem:[%s3793_s1 + $0x28] sm:$0xff]  ;;  %s3748_s20 = scalar_lea.hbm %s3799_s7, %s2142_s15  ;;  %s1976_s21 = scalar_lea.sflag [#allocation7], %s2996_s16 }
  0x55   : > { %416 = vst.msk [vmem:[#allocation2 + $0x68] sm:$0xff] %vm402_vm0, %v3066_v28  ;;  %417 = vst.msk [vmem:[#allocation2 + $0x70] sm:$0xff] %vm402_vm0, %v3069_v29  ;;  %v706_v37 = vld [vmem:[%s3793_s1 + $0x38] sm:$0xff]  ;;  %v2355_v38 = vpack.c.bf16 %v701_v35, %v699_v33  ;;  %v703_v40 = vld [vmem:[%s3793_s1 + $0x20] sm:$0xff]  ;;  %p3821_p12 = scmp.ne.s32.totalorder %s3810_s12, 0  ;;  %s2842_s28 = smov [#allocation8]  }
  0x56   : > { %418 = vst.msk [vmem:[#allocation2 + $0x78] sm:$0xff] %vm402_vm0, %v3072_v30  ;;  %v2357_v39 = vpack.c.bf16 %v706_v37, %v704_v36  ;;  %v705_v41 = vld [vmem:[%s3793_s1 + $0x30] sm:$0xff]  ;;  %499 = vrot.lane.b32.xlu0 %v387_v19, %s2836_s14  ;;  %566 = vrot.lane.b32.xlu1 %v3015_v18, %s3818_s17  ;;  %v708_v42 = vld [vmem:[%s3793_s1 + $0x48] sm:$0xff]  ;;  %v1080_v2 = vld [vmem:[#allocation5 + $0x18] sm:$0xff] }
  0x57   : > { %v710_v43 = vld [vmem:[%s3793_s1 + $0x58] sm:$0xff]  ;;  %2354 = vmatprep.subr.bf16.mxu0 %v2353_v34  ;;  %v2359_v44 = vpack.c.bf16 %v705_v41, %v703_v40  ;;  %v707_v46 = vld [vmem:[%s3793_s1 + $0x40] sm:$0xff]  ;;  %v709_v47 = vld [vmem:[%s3793_s1 + $0x50] sm:$0xff] }
  0x58   : > { %2356 = vmatpush1.bf16.msra.mxu0 %v2355_v38  ;;  %v2361_v45 = vpack.c.bf16 %v710_v43, %v708_v42  ;;  %v712_v48 = vld [vmem:[%s3793_s1 + $0x68] sm:$0xff]  ;;  %v714_v49 = vld [vmem:[%s3793_s1 + $0x78] sm:$0xff]  ;;  %v2363_v50 = vpack.c.bf16 %v709_v47, %v707_v46  ;;  %v711_v52 = vld [vmem:[%s3793_s1 + $0x60] sm:$0xff] }
  0x59   : > { %2358 = vmatprep.subr.bf16.mxu0 %v2357_v39  ;;  %v2365_v51 = vpack.c.bf16 %v714_v49, %v712_v48  ;;  %v713_v53 = vld [vmem:[%s3793_s1 + $0x70] sm:$0xff]  ;;  %v716_v54 = vld [vmem:[%s3793_s1 + $0x88] sm:$0xff]  ;;  %v718_v55 = vld [vmem:[%s3793_s1 + $0x98] sm:$0xff] }
  0x5a   : > { %629 = vrot.lane.b32.xlu0 %v3026_v20, %s3819_s23  ;;  %438 = vrot.lane.b32.xlu1 %v387_v19, %s3820_s29  ;;  %v2367_v56 = vpack.c.bf16 %v713_v53, %v711_v52  ;;  %v2369_v57 = vpack.c.bf16 %v718_v55, %v716_v54  ;;  %v715_v58 = vld [vmem:[%s3793_s1 + $0x80] sm:$0xff]  ;;  %v717_v59 = vld [vmem:[%s3793_s1 + $0x90] sm:$0xff]  ;;  %v1078_v1 = vld [vmem:[#allocation5 + $0x8] sm:$0xff] }
  0x5b   : > { %v2371_v60 = vpack.c.bf16 %v717_v59, %v715_v58  ;;  %v400_v61 = vld [vmem:[%s2999_s9 + $0x70] sm:$0xff]  ;;  %v401_v62 = vld [vmem:[%s2999_s9 + $0x78] sm:$0xff]  ;;  %v1077_v3 = vld [vmem:[#allocation5] sm:$0xff]  ;;  %v2373_v4 = vpack.c.bf16 %v1080_v2, %v1078_v1  ;;  %s2768_s9 = sshll.u32 %s2842_s28, 4  ;;  %s2769_s9 = int_to_ptr.vmem [resolvable:$false] %s2768_s9 }
  0x5c   : > { %2360 = vmatpush1.bf16.msra.mxu0 %v2359_v44  ;;  %v1079_v5 = vld [vmem:[#allocation5 + $0x10] sm:$0xff]  ;;  %v1082_v6 = vld [vmem:[#allocation5 + $0x28] sm:$0xff]  ;;  %v1084_v7 = vld [vmem:[#allocation5 + $0x38] sm:$0xff] }
  0x5d   : > { %2362 = vmatprep.subr.bf16.mxu0 %v2361_v45  ;;  %v2375_v8 = vpack.c.bf16 %v1079_v5, %v1077_v3  ;;  %v2377_v9 = vpack.c.bf16 %v1084_v7, %v1082_v6  ;;  %v1081_v10 = vld [vmem:[#allocation5 + $0x20] sm:$0xff]  ;;  %v1083_v11 = vld [vmem:[#allocation5 + $0x30] sm:$0xff]  ;;  %v1086_v12 = vld [vmem:[#allocation5 + $0x48] sm:$0xff]  ;;  %2374 = vmatprep.subr.bf16.mxu1 %v2373_v4 }
  0x5e   : > { %501 = vrot.lane.b32.xlu0 %v3015_v18, %s2836_s14  ;;  %568 = vrot.lane.b32.xlu1 %v3026_v20, %s3818_s17  ;;  %v1088_v13 = vld [vmem:[#allocation5 + $0x58] sm:$0xff]  ;;  %v2379_v17 = vpack.c.bf16 %v1083_v11, %v1081_v10  ;;  %v1085_v19 = vld [vmem:[#allocation5 + $0x40] sm:$0xff]  ;;  %v1095_v37 = vld [vmem:[#allocation5 + $0x90] sm:$0xff] }
  0x5f   : > { %2376 = vmatpush1.bf16.msra.mxu1 %v2375_v8  ;;  %v1093_v36 = vld [vmem:[#allocation5 + $0x80] sm:$0xff]  ;;  %v1098_v38 = vld [vmem:[#allocation5 + $0xa8] sm:$0xff]  ;;  %v1100_v39 = vld [vmem:[#allocation5 + $0xb8] sm:$0xff] }
  0x60   : > { %2364 = vmatpush1.bf16.msra.mxu0 %v2363_v50  ;;  %2378 = vmatprep.subr.bf16.mxu1 %v2377_v9  ;;  %v2391_v42 = vpack.c.bf16 %v1095_v37, %v1093_v36  ;;  %v2393_v43 = vpack.c.bf16 %v1100_v39, %v1098_v38  ;;  %v1097_v44 = vld [vmem:[#allocation5 + $0xa0] sm:$0xff]  ;;  %v1099_v45 = vld [vmem:[#allocation5 + $0xb0] sm:$0xff]  ;;  %v1102_v46 = vld [vmem:[#allocation5 + $0xc8] sm:$0xff] }
  0x61   : > { %2366 = vmatprep.subr.bf16.mxu0 %v2365_v51  ;;  %v1104_v47 = vld [vmem:[#allocation5 + $0xd8] sm:$0xff]  ;;  %v2395_v51 = vpack.c.bf16 %v1099_v45, %v1097_v44  ;;  %v1101_v53 = vld [vmem:[#allocation5 + $0xc0] sm:$0xff]  ;;  %v1103_v54 = vld [vmem:[#allocation5 + $0xd0] sm:$0xff] }
  0x62   : > { %631 = vrot.lane.b32.xlu0 %v3029_v21, %s3819_s23  ;;  %440 = vrot.lane.b32.xlu1 %v3015_v18, %s3820_s29  ;;  %v2381_v18 = vpack.c.bf16 %v1088_v13, %v1086_v12  ;;  %v2397_v52 = vpack.c.bf16 %v1104_v47, %v1102_v46  ;;  %v1106_v55 = vld [vmem:[#allocation5 + $0xe8] sm:$0xff]  ;;  %v2399_v59 = vpack.c.bf16 %v1103_v54, %v1101_v53  ;;  %v1109_v6 = vld [vmem:[#allocation5 + $0x100] sm:$0xff]  ;;  %v1111_v7 = vld [vmem:[#allocation5 + $0x110] sm:$0xff] }
  0x63   : > { %2380 = vmatpush1.bf16.msra.mxu1 %v2379_v17  ;;  %v1114_v8 = vld [vmem:[#allocation5 + $0x128] sm:$0xff]  ;;  %v1116_v9 = vld [vmem:[#allocation5 + $0x138] sm:$0xff]  ;;  %v2407_v12 = vpack.c.bf16 %v1111_v7, %v1109_v6  ;;  %v1125_v7 = vld [vmem:[#allocation5 + $0x180] sm:$0xff] }
  0x64   : > { %2368 = vmatpush1.bf16.msra.mxu0 %v2367_v56  ;;  %2382 = vmatprep.subr.bf16.mxu1 %v2381_v18  ;;  %v1108_v56 = vld [vmem:[#allocation5 + $0xf8] sm:$0xff]  ;;  %v2409_v13 = vpack.c.bf16 %v1116_v9, %v1114_v8  ;;  %v1118_v17 = vld [vmem:[#allocation5 + $0x148] sm:$0xff]  ;;  %v1127_v8 = vld [vmem:[#allocation5 + $0x190] sm:$0xff] }
  0x65   : > { %2370 = vmatprep.subr.bf16.mxu0 %v2369_v57  ;;  %v1120_v18 = vld [vmem:[#allocation5 + $0x158] sm:$0xff] }
  0x66   : > { %503 = vrot.lane.b32.xlu0 %v3026_v20, %s2836_s14  ;;  %570 = vrot.lane.b32.xlu1 %v3029_v21, %s3818_s17 }
  0x68   : > { %2372 = vmatpush1.bf16.msra.mxu0 %v2371_v60  ;;  %v2401_v60 = vpack.c.bf16 %v1108_v56, %v1106_v55 }
  0x6a   : > { %633 = vrot.lane.b32.xlu0 %v3036_v22, %s3819_s23  ;;  %442 = vrot.lane.b32.xlu1 %v3026_v20, %s3820_s29  ;;  %v1087_v20 = vld [vmem:[#allocation5 + $0x50] sm:$0xff] }
  0x6e   : > { %505 = vrot.lane.b32.xlu0 %v3029_v21, %s2836_s14  ;;  %572 = vrot.lane.b32.xlu1 %v3036_v22, %s3818_s17 }
  0x72   : > { %635 = vrot.lane.b32.xlu0 %v3039_v23, %s3819_s23  ;;  %444 = vrot.lane.b32.xlu1 %v3029_v21, %s3820_s29  ;;  %v1090_v21 = vld [vmem:[#allocation5 + $0x68] sm:$0xff] }
  0x76   : > { %507 = vrot.lane.b32.xlu0 %v3036_v22, %s2836_s14  ;;  %574 = vrot.lane.b32.xlu1 %v3039_v23, %s3818_s17 }
  0x7a   : > { %637 = vrot.lane.b32.xlu0 %v3042_v24, %s3819_s23  ;;  %446 = vrot.lane.b32.xlu1 %v3036_v22, %s3820_s29  ;;  %v1092_v22 = vld [vmem:[#allocation5 + $0x78] sm:$0xff] }
  0x7e   : > { %509 = vrot.lane.b32.xlu0 %v3039_v23, %s2836_s14  ;;  %576 = vrot.lane.b32.xlu1 %v3042_v24, %s3818_s17 }
  0x82   : > { %639 = vrot.lane.b32.xlu0 %v3051_v25, %s3819_s23  ;;  %448 = vrot.lane.b32.xlu1 %v3039_v23, %s3820_s29 }
  0x86   : > { %511 = vrot.lane.b32.xlu0 %v3042_v24, %s2836_s14  ;;  %578 = vrot.lane.b32.xlu1 %v3051_v25, %s3818_s17 }
  0x8a   : > { %641 = vrot.lane.b32.xlu0 %v3054_v26, %s3819_s23  ;;  %450 = vrot.lane.b32.xlu1 %v3042_v24, %s3820_s29 }
  0x8e   : > { %513 = vrot.lane.b32.xlu0 %v3051_v25, %s2836_s14  ;;  %580 = vrot.lane.b32.xlu1 %v3054_v26, %s3818_s17 }
  0x92   : > { %643 = vrot.lane.b32.xlu0 %v3057_v27, %s3819_s23  ;;  %452 = vrot.lane.b32.xlu1 %v3051_v25, %s3820_s29  ;;  %v2383_v25 = vpack.c.bf16 %v1087_v20, %v1085_v19 }
  0x94   : > { %2384 = vmatpush1.bf16.msra.mxu1 %v2383_v25  ;;  %v1119_v25 = vld [vmem:[#allocation5 + $0x150] sm:$0xff] }
  0x96   : > { %515 = vrot.lane.b32.xlu0 %v3054_v26, %s2836_s14  ;;  %582 = vrot.lane.b32.xlu1 %v3057_v27, %s3818_s17 }
  0x9a   : > { %645 = vrot.lane.b32.xlu0 %v3066_v28, %s3819_s23  ;;  %454 = vrot.lane.b32.xlu1 %v3054_v26, %s3820_s29  ;;  %v2385_v26 = vpack.c.bf16 %v1092_v22, %v1090_v21 }
  0x9c   : > { %2386 = vmatprep.subr.bf16.mxu1 %v2385_v26  ;;  %v1122_v26 = vld [vmem:[#allocation5 + $0x168] sm:$0xff] }
  0x9e   : > { %517 = vrot.lane.b32.xlu0 %v3057_v27, %s2836_s14  ;;  %584 = vrot.lane.b32.xlu1 %v3066_v28, %s3818_s17 }
  0xa2   : > { %647 = vrot.lane.b32.xlu0 %v3069_v29, %s3819_s23  ;;  %456 = vrot.lane.b32.xlu1 %v3057_v27, %s3820_s29  ;;  %v1089_v27 = vld [vmem:[#allocation5 + $0x60] sm:$0xff] }
  0xa6   : > { %519 = vrot.lane.b32.xlu0 %v3066_v28, %s2836_s14  ;;  %586 = vrot.lane.b32.xlu1 %v3069_v29, %s3818_s17 }
  0xaa   : > { %649 = vrot.lane.b32.xlu0 %v3072_v30, %s3819_s23  ;;  %458 = vrot.lane.b32.xlu1 %v3066_v28, %s3820_s29  ;;  %v1091_v28 = vld [vmem:[#allocation5 + $0x70] sm:$0xff] }
  0xab   : > { %v2387_v33 = vpack.c.bf16 %v1091_v28, %v1089_v27  ;;  %v1124_v27 = vld [vmem:[#allocation5 + $0x178] sm:$0xff] }
  0xad   : > { %2388 = vmatpush1.bf16.msra.mxu1 %v2387_v33  ;;  %v1123_v33 = vld [vmem:[#allocation5 + $0x170] sm:$0xff] }
  0xae   : > { %521 = vrot.lane.b32.xlu0 %v3069_v29, %s2836_s14  ;;  %588 = vrot.lane.b32.xlu1 %v3072_v30, %s3818_s17 }
  0xb2   : > { %651 = vrot.lane.b32.xlu0 %v400_v61, %s3819_s23  ;;  %460 = vrot.lane.b32.xlu1 %v3069_v29, %s3820_s29  ;;  %v1094_v29 = vld [vmem:[#allocation5 + $0x88] sm:$0xff] }
  0xb6   : > { %523 = vrot.lane.b32.xlu0 %v3072_v30, %s2836_s14  ;;  %590 = vrot.lane.b32.xlu1 %v400_v61, %s3818_s17 }
  0xba   : > { %653 = vrot.lane.b32.xlu0 %v401_v62, %s3819_s23  ;;  %462 = vrot.lane.b32.xlu1 %v3072_v30, %s3820_s29  ;;  %v1096_v30 = vld [vmem:[#allocation5 + $0x98] sm:$0xff] }
  0xbb   : > { %v2389_v35 = vpack.c.bf16 %v1096_v30, %v1094_v29 }
  0xbd   : > { %2390 = vmatprep.subr.bf16.mxu1 %v2389_v35 }
  0xbe   : > { %525 = vrot.lane.b32.xlu0 %v400_v61, %s2836_s14  ;;  %592 = vrot.lane.b32.xlu1 %v401_v62, %s3818_s17  ;;  %s2075_s17 = sshll.u32 %s2996_s16, 3 }
  0xbf   : > { %2392 = vmatpush1.bf16.msra.mxu1 %v2391_v42  ;;  %s385_s19 = scalar_lea.vmem [#allocation8], %s2075_s17 }
  0xc0   : > { %v498_v63 = vpop.permute.xlu0 %497  ;;  %v628_v0 = vpop.permute.xlu1 %627  ;;  %2394 = vmatprep.subr.bf16.mxu1 %v2393_v43  ;;  %s1989_s18 = sshll.u32 %s385_s19, 4  ;;  %s3750_s18 = int_to_ptr.vmem [resolvable:$true] %s1989_s18 }
  0xc1   : > { %546 = vst.msk [vmem:[#allocation2] sm:$0xff] %vm545_vm2, %v498_v63  ;;  %v1110_v63 = vld [vmem:[#allocation5 + $0x108] sm:$0xff]  ;;  %s2764_s22 = scalar_lea.vmem %s3750_s18, 128  ;;  %p2771_p4 = scmp.lt.s32.totalorder %s3750_s18, %s2769_s9 }
  0xc2   : > { %464 = vrot.lane.b32.xlu0 %v400_v61, %s3820_s29  ;;  %527 = vrot.lane.b32.xlu1 %v401_v62, %s2836_s14  ;;  %v1105_v61 = vld [vmem:[#allocation5 + $0xe0] sm:$0xff]  ;;  %v1107_v62 = vld [vmem:[#allocation5 + $0xf0] sm:$0xff]  ;;  %p2765_p11 = scmp.ne.s32.totalorder %s3750_s18, %s2764_s22  ;;  %s2770_s14 = scalar_lea.vmem %s2769_s9, 256 }
  0xc3   : > { %2396 = vmatpush1.bf16.msra.mxu1 %v2395_v51  ;;  %v2403_v4 = vpack.c.bf16 %v1107_v62, %v1105_v61  ;;  %p2772_p7 = scmp.lt.s32.totalorder %s2770_s14, %s2764_s22 }
  0xc4   : > { %v565_v14 = vpop.permute.xlu0 %564  ;;  %v437_v15 = vpop.permute.xlu1 %436  ;;  %2398 = vmatprep.subr.bf16.mxu1 %v2397_v52  ;;  %p2766_p0 = pnand %p2765_p11, %p3821_p12 }
  0xc5   : > { %609 = vst.msk [vmem:[#allocation2] sm:$0xff] %vm562_vm3, %v565_v14  ;;  %v1113_v14 = vld [vmem:[#allocation5 + $0x120] sm:$0xff]  ;;  %p2773_p8 = por %p2772_p7, %p2771_p4 }
  0xc6   : > { %481 = vst.msk [vmem:[#allocation2 + $0x8] sm:$0xff] %vm419_vm1, %v437_v15  ;;  %v1115_v15 = vld [vmem:[#allocation5 + $0x130] sm:$0xff]  ;;  %p2767_p3 = pneg %p2766_p0 }
  0xc7   : > { %669 = vst.msk [vmem:[#allocation2] sm:$0xff] %vm624_vm4, %v628_v0  ;;  %v1112_v0 = vld [vmem:[#allocation5 + $0x118] sm:$0xff]  ;;  %2400 = vmatpush1.bf16.msra.mxu1 %v2399_v59  ;;  %v2411_v22 = vpack.c.bf16 %v1115_v15, %v1113_v14  ;;  %v1129_v15 = vld [vmem:[#allocation5 + $0x1a0] sm:$0xff] }
  0xc8   : > { %v500_v23 = vpop.permute.xlu0 %499  ;;  %v567_v24 = vpop.permute.xlu1 %566  ;;  %2402 = vmatprep.subr.bf16.mxu1 %v2401_v60  ;;  %v2405_v5 = vpack.c.bf16 %v1112_v0, %v1110_v63  ;;  %p2774_p9 = pnand %p2773_p8, %p2767_p3 }
  0xc9   : > { %547 = vst.msk [vmem:[#allocation2 + $0x8] sm:$0xff] %vm545_vm2, %v500_v23  ;;  %v2413_v23 = vpack.c.bf16 %v1120_v18, %v1118_v17  ;;  %v1131_v17 = vld [vmem:[#allocation5 + $0x1b0] sm:$0xff] }
  0xca   : > { %610 = vst.msk [vmem:[#allocation2 + $0x8] sm:$0xff] %vm562_vm3, %v567_v24  ;;  %v1117_v24 = vld [vmem:[#allocation5 + $0x140] sm:$0xff] }
  0xcb   : > { %2404 = vmatpush1.bf16.msra.mxu1 %v2403_v4  ;;  %v2415_v30 = vpack.c.bf16 %v1119_v25, %v1117_v24  ;;  %v1126_v4 = vld [vmem:[#allocation5 + $0x188] sm:$0xff]  ;;  %v1133_v25 = vld [vmem:[#allocation5 + $0x1c0] sm:$0xff] }
  0xcc   : > { %v630_v31 = vpop.permute.xlu0 %629  ;;  %v439_v32 = vpop.permute.xlu1 %438  ;;  %2406 = vmatprep.subr.bf16.mxu1 %v2405_v5  ;;  %v1128_v5 = vld [vmem:[#allocation5 + $0x198] sm:$0xff] }
  0xcd   : > { %670 = vst.msk [vmem:[#allocation2 + $0x8] sm:$0xff] %vm624_vm4, %v630_v31  ;;  %v2417_v31 = vpack.c.bf16 %v1124_v27, %v1122_v26  ;;  %v2421_v6 = vpack.c.bf16 %v1128_v5, %v1126_v4  ;;  %v1135_v26 = vld [vmem:[#allocation5 + $0x1d0] sm:$0xff] }
  0xce   : > { %v683_v34 = vld [vmem:[#allocation2] sm:$0xff]  ;;  %482 = vst.msk [vmem:[#allocation2 + $0x10] sm:$0xff] %vm419_vm1, %v439_v32  ;;  %v1155_v4 = vld [vmem:[#allocation5 + $0x270] sm:$0xff] }
  0xcf   : > { %2076 = vmatmul.mubr.msk.f32.vlgmr.msra.gmra.mrb[0].mxu0 %vm731_vm5, %v683_v34  ;;  %2408 = vmatpush1.bf16.msra.mxu1 %v2407_v12  ;;  %v1121_v32 = vld [vmem:[#allocation5 + $0x160] sm:$0xff]  ;;  %v1130_v12 = vld [vmem:[#allocation5 + $0x1a8] sm:$0xff] }
  0xd0   : > { %850 = vmatprep.mubr.f32.mxu0 %v2835_v16  ;;  %v502_v40 = vpop.permute.xlu0 %501  ;;  %v569_v41 = vpop.permute.xlu1 %568  ;;  %2410 = vmatprep.subr.bf16.mxu1 %v2409_v13  ;;  %v2419_v37 = vpack.c.bf16 %v1123_v33, %v1121_v32  ;;  %v1132_v13 = vld [vmem:[#allocation5 + $0x1b8] sm:$0xff]  ;;  %v1137_v33 = vld [vmem:[#allocation5 + $0x1e0] sm:$0xff] }
  0xd1   : > { %548 = vst.msk [vmem:[#allocation2 + $0x10] sm:$0xff] %vm545_vm2, %v502_v40  ;;  %v2425_v14 = vpack.c.bf16 %v1132_v13, %v1130_v12  ;;  %v1162_v12 = vld [vmem:[#allocation5 + $0x2a8] sm:$0xff]  ;;  %v1164_v13 = vld [vmem:[#allocation5 + $0x2b8] sm:$0xff] }
  0xd2   : > { %611 = vst.msk [vmem:[#allocation2 + $0x10] sm:$0xff] %vm562_vm3, %v569_v41 }
  0xd3   : > { %2412 = vmatpush1.bf16.msra.mxu1 %v2411_v22  ;;  %v1134_v22 = vld [vmem:[#allocation5 + $0x1c8] sm:$0xff] }
  0xd4   : > { %v632_v48 = vpop.permute.xlu0 %631  ;;  %v684_v49 = vld [vmem:[#allocation2 + $0x8] sm:$0xff]  ;;  %v441_v50 = vpop.permute.xlu1 %440  ;;  %2414 = vmatprep.subr.bf16.mxu1 %v2413_v23  ;;  %v1136_v23 = vld [vmem:[#allocation5 + $0x1d8] sm:$0xff] }
  0xd5   : > { %671 = vst.msk [vmem:[#allocation2 + $0x10] sm:$0xff] %vm624_vm4, %v632_v48  ;;  %2077 = vmatmul.mubr.msk.f32.gmra.mrb[2].mxu0 %vm731_vm5, %v684_v49  ;;  %v2429_v24 = vpack.c.bf16 %v1136_v23, %v1134_v22  ;;  %v1165_v22 = vld [vmem:[#allocation5 + $0x2c0] sm:$0xff]  ;;  %v1167_v23 = vld [vmem:[#allocation5 + $0x2d0] sm:$0xff] }
  0xd6   : > { %483 = vst.msk [vmem:[#allocation2 + $0x18] sm:$0xff] %vm419_vm1, %v441_v50  ;;  %856 = vmatprep.mubr.f32.mxu0 %v2835_v16 }
  0xd7   : > { %2416 = vmatpush1.bf16.msra.mxu1 %v2415_v30  ;;  %v1138_v30 = vld [vmem:[#allocation5 + $0x1e8] sm:$0xff] }
  0xd8   : > { %v504_v57 = vpop.permute.xlu0 %503  ;;  %v571_v58 = vpop.permute.xlu1 %570  ;;  %2418 = vmatprep.subr.bf16.mxu1 %v2417_v31  ;;  %v1140_v31 = vld [vmem:[#allocation5 + $0x1f8] sm:$0xff] }
  0xd9   : > { %549 = vst.msk [vmem:[#allocation2 + $0x18] sm:$0xff] %vm545_vm2, %v504_v57  ;;  %v2433_v32 = vpack.c.bf16 %v1140_v31, %v1138_v30  ;;  %v1174_v31 = vld [vmem:[#allocation5 + $0x308] sm:$0xff] }
  0xda   : > { %612 = vst.msk [vmem:[#allocation2 + $0x18] sm:$0xff] %vm562_vm3, %v571_v58 }
  0xdb   : > { %2420 = vmatpush1.bf16.msra.mxu1 %v2419_v37 }
  0xdc   : > { %v634_v1 = vpop.permute.xlu0 %633  ;;  %v685_v2 = vld [vmem:[#allocation2 + $0x10] sm:$0xff]  ;;  %v443_v3 = vpop.permute.xlu1 %442  ;;  %2422 = vmatprep.subr.bf16.mxu1 %v2421_v6  ;;  %v1158_v6 = vld [vmem:[#allocation5 + $0x288] sm:$0xff] }
  0xdd   : > { %672 = vst.msk [vmem:[#allocation2 + $0x18] sm:$0xff] %vm624_vm4, %v634_v1  ;;  %2078 = vmatmul.mubr.msk.f32.gmra.mrb[4].mxu0 %vm731_vm5, %v685_v2 }
  0xde   : > { %484 = vst.msk [vmem:[#allocation2 + $0x20] sm:$0xff] %vm419_vm1, %v443_v3  ;;  %862 = vmatprep.mubr.f32.mxu0 %v2835_v16 }
  0xe0   : > { %v506_v10 = vpop.permute.xlu0 %505  ;;  %v573_v11 = vpop.permute.xlu1 %572 }
  0xe1   : > { %550 = vst.msk [vmem:[#allocation2 + $0x20] sm:$0xff] %vm545_vm2, %v506_v10 }
  0xe2   : > { %613 = vst.msk [vmem:[#allocation2 + $0x20] sm:$0xff] %vm562_vm3, %v573_v11  ;;  %v2423_v11 = vpack.c.bf16 %v1127_v8, %v1125_v7  ;;  %v1160_v7 = vld [vmem:[#allocation5 + $0x298] sm:$0xff]  ;;  %v1157_v8 = vld [vmem:[#allocation5 + $0x280] sm:$0xff] }
  0xe4   : > { %v636_v19 = vpop.permute.xlu0 %635  ;;  %v686_v20 = vld [vmem:[#allocation2 + $0x18] sm:$0xff]  ;;  %v445_v21 = vpop.permute.xlu1 %444  ;;  %2424 = vmatpush1.bf16.msra.mxu1 %v2423_v11 }
  0xe5   : > { %673 = vst.msk [vmem:[#allocation2 + $0x20] sm:$0xff] %vm624_vm4, %v636_v19  ;;  %2079 = vmatmul.mubr.msk.f32.gmra.mrb[6].mxu0 %vm731_vm5, %v686_v20  ;;  %2426 = vmatprep.subr.bf16.mxu1 %v2425_v14  ;;  %v2457_v14 = vpack.c.bf16 %v1164_v13, %v1162_v12  ;;  %v1201_v12 = vld [vmem:[#allocation5 + $0x3e0] sm:$0xff]  ;;  %v1203_v13 = vld [vmem:[#allocation5 + $0x3f0] sm:$0xff] }
  0xe6   : > { %485 = vst.msk [vmem:[#allocation2 + $0x28] sm:$0xff] %vm419_vm1, %v445_v21  ;;  %868 = vmatprep.mubr.f32.mxu0 %v2835_v16  ;;  %v2427_v21 = vpack.c.bf16 %v1131_v17, %v1129_v15  ;;  %v1161_v15 = vld [vmem:[#allocation5 + $0x2a0] sm:$0xff]  ;;  %v1163_v17 = vld [vmem:[#allocation5 + $0x2b0] sm:$0xff] }
  0xe8   : > { %v508_v28 = vpop.permute.xlu0 %507  ;;  %v575_v29 = vpop.permute.xlu1 %574  ;;  %2428 = vmatpush1.bf16.msra.mxu1 %v2427_v21 }
  0xe9   : > { %551 = vst.msk [vmem:[#allocation2 + $0x28] sm:$0xff] %vm545_vm2, %v508_v28  ;;  %2430 = vmatprep.subr.bf16.mxu1 %v2429_v24  ;;  %v2463_v24 = vpack.c.bf16 %v1167_v23, %v1165_v22  ;;  %v719_v22 = vld [vmem:[%s3794_s2] sm:$0x3] }
  0xea   : > { %614 = vst.msk [vmem:[#allocation2 + $0x28] sm:$0xff] %vm562_vm3, %v575_v29  ;;  %v2431_v29 = vpack.c.bf16 %v1135_v26, %v1133_v25  ;;  %v1170_v25 = vld [vmem:[#allocation5 + $0x2e8] sm:$0xff]  ;;  %v1172_v26 = vld [vmem:[#allocation5 + $0x2f8] sm:$0xff] }
  0xec   : > { %v638_v34 = vpop.permute.xlu0 %637  ;;  %v687_v35 = vld [vmem:[#allocation2 + $0x20] sm:$0xff]  ;;  %v447_v36 = vpop.permute.xlu1 %446  ;;  %2432 = vmatpush1.bf16.msra.mxu1 %v2431_v29  ;;  %v1171_v29 = vld [vmem:[#allocation5 + $0x2f0] sm:$0xff] }
  0xed   : > { %674 = vst.msk [vmem:[#allocation2 + $0x28] sm:$0xff] %vm624_vm4, %v638_v34  ;;  %2080 = vmatmul.mubr.msk.f32.gmra.mrb[8].mxu0 %vm731_vm5, %v687_v35  ;;  %v1139_v34 = vld [vmem:[#allocation5 + $0x1f0] sm:$0xff]  ;;  %2434 = vmatprep.subr.bf16.mxu1 %v2433_v32  ;;  %v1176_v32 = vld [vmem:[#allocation5 + $0x318] sm:$0xff] }
  0xee   : > { %486 = vst.msk [vmem:[#allocation2 + $0x30] sm:$0xff] %vm419_vm1, %v447_v36  ;;  %874 = vmatprep.mubr.f32.mxu0 %v2835_v16 }
  0xf0   : > { %v510_v38 = vpop.permute.xlu0 %509  ;;  %v577_v39 = vpop.permute.xlu1 %576 }
  0xf1   : > { %552 = vst.msk [vmem:[#allocation2 + $0x30] sm:$0xff] %vm545_vm2, %v510_v38  ;;  %v2435_v38 = vpack.c.bf16 %v1139_v34, %v1137_v33  ;;  %v1173_v33 = vld [vmem:[#allocation5 + $0x300] sm:$0xff]  ;;  %v2469_v34 = vpack.c.bf16 %v1176_v32, %v1174_v31 }
  0xf2   : > { %615 = vst.msk [vmem:[#allocation2 + $0x30] sm:$0xff] %vm562_vm3, %v577_v39 }
  0xf3   : > { %2436 = vmatpush1.bf16.msra.mxu1 %v2435_v38  ;;  %v1180_v38 = vld [vmem:[#allocation5 + $0x338] sm:$0xff] }
  0xf4   : > { %v640_v40 = vpop.permute.xlu0 %639  ;;  %v688_v41 = vld [vmem:[#allocation2 + $0x28] sm:$0xff]  ;;  %v449_v42 = vpop.permute.xlu1 %448 }
  0xf5   : > { %675 = vst.msk [vmem:[#allocation2 + $0x30] sm:$0xff] %vm624_vm4, %v640_v40  ;;  %2081 = vmatmul.mubr.msk.f32.gmra.mrb[10].mxu0 %vm731_vm5, %v688_v41 }
  0xf6   : > { %487 = vst.msk [vmem:[#allocation2 + $0x38] sm:$0xff] %vm419_vm1, %v449_v42  ;;  %880 = vmatprep.mubr.f32.mxu0 %v2835_v16  ;;  %1314 = vmatmul.mubr.f32.vlgmr.msra.gmra.mrb[0].mxu1 %v2835_v16 }
  0xf8   : > { %v512_v43 = vpop.permute.xlu0 %511  ;;  %v579_v44 = vpop.permute.xlu1 %578 }
  0xf9   : > { %553 = vst.msk [vmem:[#allocation2 + $0x38] sm:$0xff] %vm545_vm2, %v512_v43 }
  0xfa   : > { %616 = vst.msk [vmem:[#allocation2 + $0x38] sm:$0xff] %vm562_vm3, %v579_v44 }
  0xfc   : > { %v642_v45 = vpop.permute.xlu0 %641  ;;  %v689_v46 = vld [vmem:[#allocation2 + $0x30] sm:$0xff]  ;;  %v451_v47 = vpop.permute.xlu1 %450 }
  0xfd   : > { %676 = vst.msk [vmem:[#allocation2 + $0x38] sm:$0xff] %vm624_vm4, %v642_v45  ;;  %2082 = vmatmul.mubr.msk.f32.gmra.mrb[12].mxu0 %vm731_vm5, %v689_v46  ;;  %v1142_v46 = vld [vmem:[#allocation5 + $0x208] sm:$0xff] }
  0xfe   : > { %488 = vst.msk [vmem:[#allocation2 + $0x40] sm:$0xff] %vm419_vm1, %v451_v47  ;;  %886 = vmatprep.mubr.f32.mxu0 %v2835_v16  ;;  %v1144_v47 = vld [vmem:[#allocation5 + $0x218] sm:$0xff] }
 0x100   : > { %v514_v48 = vpop.permute.xlu0 %513  ;;  %v581_v49 = vpop.permute.xlu1 %580 }
 0x101   : > { %554 = vst.msk [vmem:[#allocation2 + $0x40] sm:$0xff] %vm545_vm2, %v514_v48  ;;  %v1141_v48 = vld [vmem:[#allocation5 + $0x200] sm:$0xff] }
 0x102   : > { %617 = vst.msk [vmem:[#allocation2 + $0x40] sm:$0xff] %vm562_vm3, %v581_v49  ;;  %v2437_v49 = vpack.c.bf16 %v1144_v47, %v1142_v46  ;;  %v1181_v46 = vld [vmem:[#allocation5 + $0x340] sm:$0xff]  ;;  %v1183_v47 = vld [vmem:[#allocation5 + $0x350] sm:$0xff] }
 0x104   : > { %v644_v50 = vpop.permute.xlu0 %643  ;;  %v690_v51 = vld [vmem:[#allocation2 + $0x38] sm:$0xff]  ;;  %v453_v52 = vpop.permute.xlu1 %452  ;;  %2438 = vmatprep.subr.bf16.mxu1 %v2437_v49  ;;  %v1186_v49 = vld [vmem:[#allocation5 + $0x368] sm:$0xff] }
 0x105   : > { %677 = vst.msk [vmem:[#allocation2 + $0x40] sm:$0xff] %vm624_vm4, %v644_v50  ;;  %2083 = vmatmul.mubr.msk.f32.gmra.mrb[14].mxu0 %vm731_vm5, %v690_v51  ;;  %v1143_v50 = vld [vmem:[#allocation5 + $0x210] sm:$0xff] }
 0x106   : > { %489 = vst.msk [vmem:[#allocation2 + $0x48] sm:$0xff] %vm419_vm1, %v453_v52  ;;  %892 = vmatprep.mubr.f32.mxu0 %v2835_v16  ;;  %v2439_v51 = vpack.c.bf16 %v1143_v50, %v1141_v48  ;;  %v1146_v52 = vld [vmem:[#allocation5 + $0x228] sm:$0xff]  ;;  %v2479_v48 = vpack.c.bf16 %v1183_v47, %v1181_v46  ;;  %v1188_v50 = vld [vmem:[#allocation5 + $0x378] sm:$0xff] }
 0x108   : > { %v516_v53 = vpop.permute.xlu0 %515  ;;  %v583_v54 = vpop.permute.xlu1 %582  ;;  %2440 = vmatpush1.bf16.msra.mxu1 %v2439_v51  ;;  %v2481_v51 = vpack.c.bf16 %v1188_v50, %v1186_v49 }
 0x109   : > { %555 = vst.msk [vmem:[#allocation2 + $0x48] sm:$0xff] %vm545_vm2, %v516_v53  ;;  %v1148_v53 = vld [vmem:[#allocation5 + $0x238] sm:$0xff] }
 0x10a   : > { %618 = vst.msk [vmem:[#allocation2 + $0x48] sm:$0xff] %vm562_vm3, %v583_v54  ;;  %v2441_v54 = vpack.c.bf16 %v1148_v53, %v1146_v52  ;;  %v1185_v52 = vld [vmem:[#allocation5 + $0x360] sm:$0xff]  ;;  %v1187_v53 = vld [vmem:[#allocation5 + $0x370] sm:$0xff] }
 0x10c   : > { %v646_v55 = vpop.permute.xlu0 %645  ;;  %v691_v56 = vld [vmem:[#allocation2 + $0x40] sm:$0xff]  ;;  %v455_v57 = vpop.permute.xlu1 %454  ;;  %2442 = vmatprep.subr.bf16.mxu1 %v2441_v54  ;;  %v2483_v54 = vpack.c.bf16 %v1187_v53, %v1185_v52 }
 0x10d   : > { %678 = vst.msk [vmem:[#allocation2 + $0x48] sm:$0xff] %vm624_vm4, %v646_v55  ;;  %2084 = vmatmul.mubr.msk.f32.gmra.mrb[16].mxu0 %vm731_vm5, %v691_v56  ;;  %v1145_v55 = vld [vmem:[#allocation5 + $0x220] sm:$0xff]  ;;  %v1147_v56 = vld [vmem:[#allocation5 + $0x230] sm:$0xff] }
 0x10e   : > { %490 = vst.msk [vmem:[#allocation2 + $0x50] sm:$0xff] %vm419_vm1, %v455_v57  ;;  %898 = vmatprep.mubr.f32.mxu0 %v2835_v16  ;;  %v2443_v57 = vpack.c.bf16 %v1147_v56, %v1145_v55  ;;  %v1190_v55 = vld [vmem:[#allocation5 + $0x388] sm:$0xff]  ;;  %v1192_v56 = vld [vmem:[#allocation5 + $0x398] sm:$0xff] }
 0x110   : > { %v518_v58 = vpop.permute.xlu0 %517  ;;  %v585_v59 = vpop.permute.xlu1 %584  ;;  %2444 = vmatpush1.bf16.msra.mxu1 %v2443_v57  ;;  %v1189_v57 = vld [vmem:[#allocation5 + $0x380] sm:$0xff] }
 0x111   : > { %556 = vst.msk [vmem:[#allocation2 + $0x50] sm:$0xff] %vm545_vm2, %v518_v58  ;;  %v1150_v58 = vld [vmem:[#allocation5 + $0x248] sm:$0xff] }
 0x112   : > { %619 = vst.msk [vmem:[#allocation2 + $0x50] sm:$0xff] %vm562_vm3, %v585_v59  ;;  %v1152_v59 = vld [vmem:[#allocation5 + $0x258] sm:$0xff] }
 0x114   : > { %v648_v60 = vpop.permute.xlu0 %647  ;;  %v692_v61 = vld [vmem:[#allocation2 + $0x48] sm:$0xff]  ;;  %v457_v62 = vpop.permute.xlu1 %456 }
 0x115   : > { %679 = vst.msk [vmem:[#allocation2 + $0x50] sm:$0xff] %vm624_vm4, %v648_v60  ;;  %2085 = vmatmul.mubr.msk.f32.gmra.mrb[18].mxu0 %vm731_vm5, %v692_v61  ;;  %v2445_v60 = vpack.c.bf16 %v1152_v59, %v1150_v58  ;;  %v1149_v61 = vld [vmem:[#allocation5 + $0x240] sm:$0xff]  ;;  %v2485_v58 = vpack.c.bf16 %v1192_v56, %v1190_v55  ;;  %v1191_v59 = vld [vmem:[#allocation5 + $0x390] sm:$0xff] }
 0x116   : > { %491 = vst.msk [vmem:[#allocation2 + $0x58] sm:$0xff] %vm419_vm1, %v457_v62  ;;  %904 = vmatprep.mubr.f32.mxu0 %v2835_v16  ;;  %v1151_v62 = vld [vmem:[#allocation5 + $0x250] sm:$0xff] }
 0x117   : > { %2446 = vmatprep.subr.bf16.mxu1 %v2445_v60  ;;  %v2487_v60 = vpack.c.bf16 %v1191_v59, %v1189_v57 }
 0x118   : > { %v520_v63 = vpop.permute.xlu0 %519  ;;  %v587_v0 = vpop.permute.xlu1 %586 }
 0x119   : > { %557 = vst.msk [vmem:[#allocation2 + $0x58] sm:$0xff] %vm545_vm2, %v520_v63  ;;  %v2447_v63 = vpack.c.bf16 %v1151_v62, %v1149_v61  ;;  %v1194_v61 = vld [vmem:[#allocation5 + $0x3a8] sm:$0xff]  ;;  %v1196_v62 = vld [vmem:[#allocation5 + $0x3b8] sm:$0xff] }
 0x11a   : > { %620 = vst.msk [vmem:[#allocation2 + $0x58] sm:$0xff] %vm562_vm3, %v587_v0  ;;  %v1154_v0 = vld [vmem:[#allocation5 + $0x268] sm:$0xff] }
 0x11b   : > { %2448 = vmatpush1.bf16.msra.mxu1 %v2447_v63  ;;  %v2489_v63 = vpack.c.bf16 %v1196_v62, %v1194_v61 }
 0x11c   : > { %v650_v1 = vpop.permute.xlu0 %649  ;;  %v693_v2 = vld [vmem:[#allocation2 + $0x50] sm:$0xff]  ;;  %v459_v3 = vpop.permute.xlu1 %458 }
 0x11d   : > { %680 = vst.msk [vmem:[#allocation2 + $0x58] sm:$0xff] %vm624_vm4, %v650_v1  ;;  %2086 = vmatmul.mubr.msk.f32.gmra.mrb[20].mxu0 %vm731_vm5, %v693_v2  ;;  %v1156_v1 = vld [vmem:[#allocation5 + $0x278] sm:$0xff] }
 0x11e   : > { %492 = vst.msk [vmem:[#allocation2 + $0x60] sm:$0xff] %vm419_vm1, %v459_v3  ;;  %910 = vmatprep.mubr.f32.mxu0 %v2835_v16  ;;  %v2449_v2 = vpack.c.bf16 %v1156_v1, %v1154_v0  ;;  %v1153_v3 = vld [vmem:[#allocation5 + $0x260] sm:$0xff]  ;;  %v1195_v1 = vld [vmem:[#allocation5 + $0x3b0] sm:$0xff] }
 0x11f   : > { %v2451_v5 = vpack.c.bf16 %v1155_v4, %v1153_v3  ;;  %v1193_v0 = vld [vmem:[#allocation5 + $0x3a0] sm:$0xff]  ;;  %v1198_v3 = vld [vmem:[#allocation5 + $0x3c8] sm:$0xff]  ;;  %v1200_v4 = vld [vmem:[#allocation5 + $0x3d8] sm:$0xff] }
 0x120   : > { %v522_v9 = vpop.permute.xlu0 %521  ;;  %v589_v10 = vpop.permute.xlu1 %588  ;;  %2450 = vmatprep.subr.bf16.mxu1 %v2449_v2  ;;  %v2491_v2 = vpack.c.bf16 %v1195_v1, %v1193_v0 }
 0x121   : > { %558 = vst.msk [vmem:[#allocation2 + $0x60] sm:$0xff] %vm545_vm2, %v522_v9  ;;  %2452 = vmatpush1.bf16.msra.mxu1 %v2451_v5  ;;  %v2453_v9 = vpack.c.bf16 %v1160_v7, %v1158_v6  ;;  %v2493_v5 = vpack.c.bf16 %v1200_v4, %v1198_v3  ;;  %v1197_v6 = vld [vmem:[#allocation5 + $0x3c0] sm:$0xff]  ;;  %v1199_v7 = vld [vmem:[#allocation5 + $0x3d0] sm:$0xff] }
 0x122   : > { %621 = vst.msk [vmem:[#allocation2 + $0x60] sm:$0xff] %vm562_vm3, %v589_v10  ;;  %v1159_v10 = vld [vmem:[#allocation5 + $0x290] sm:$0xff] }
 0x123   : > { %v2455_v11 = vpack.c.bf16 %v1159_v10, %v1157_v8  ;;  %2454 = vmatprep.subr.bf16.mxu1 %v2453_v9  ;;  %v2495_v8 = vpack.c.bf16 %v1199_v7, %v1197_v6  ;;  %v1202_v9 = vld [vmem:[#allocation5 + $0x3e8] sm:$0xff]  ;;  %v1204_v10 = vld [vmem:[#allocation5 + $0x3f8] sm:$0xff] }
 0x124   : > { %v652_v18 = vpop.permute.xlu0 %651  ;;  %v694_v19 = vld [vmem:[#allocation2 + $0x58] sm:$0xff]  ;;  %v461_v20 = vpop.permute.xlu1 %460 }
 0x125   : > { %681 = vst.msk [vmem:[#allocation2 + $0x60] sm:$0xff] %vm624_vm4, %v652_v18  ;;  %2087 = vmatmul.mubr.msk.f32.gmra.mrb[22].mxu0 %vm731_vm5, %v694_v19  ;;  %2456 = vmatpush1.bf16.msra.mxu1 %v2455_v11  ;;  %v2459_v18 = vpack.c.bf16 %v1163_v17, %v1161_v15  ;;  %v1166_v19 = vld [vmem:[#allocation5 + $0x2c8] sm:$0xff]  ;;  %v2497_v11 = vpack.c.bf16 %v1204_v10, %v1202_v9  ;;  %v1208_v17 = vld [vmem:[#allocation5 + $0x418] sm:$0xff]  ;;  %v2092_v9 = vld [vmem:[%s3797_s5 + $0x80] sm:$0xff] }
 0x126   : > { %493 = vst.msk [vmem:[#allocation2 + $0x68] sm:$0xff] %vm419_vm1, %v461_v20  ;;  %916 = vmatprep.mubr.f32.mxu0 %v2835_v16  ;;  %2458 = vmatprep.subr.bf16.mxu1 %v2457_v14  ;;  %v1168_v20 = vld [vmem:[#allocation5 + $0x2d8] sm:$0xff]  ;;  %v2499_v14 = vpack.c.bf16 %v1203_v13, %v1201_v12  ;;  %v1206_v15 = vld [vmem:[#allocation5 + $0x408] sm:$0xff]  ;;  %v2840_v12 = vmov 0.0|0.0  }
 0x127   : > { %v2461_v21 = vpack.c.bf16 %v1168_v20, %v1166_v19  ;;  %v721_v19 = vlaneseq  ;;  %v2093_v10 = vld [vmem:[%s3797_s5 + $0x88] sm:$0xff]  ;;  %2533 = vmatprep.subr.bf16.mxu0 %v2840_v12 }
 0x128   : > { %v524_v27 = vpop.permute.xlu0 %523  ;;  %v591_v28 = vpop.permute.xlu1 %590  ;;  %v2534_v13 = vpack.c.bf16 %v2093_v10, %v2092_v9 }
 0x129   : > { %559 = vst.msk [vmem:[#allocation2 + $0x68] sm:$0xff] %vm545_vm2, %v524_v27  ;;  %2460 = vmatpush1.bf16.msra.mxu1 %v2459_v18  ;;  %v2465_v27 = vpack.c.bf16 %v1172_v26, %v1170_v25  ;;  %v2501_v18 = vpack.c.bf16 %v1208_v17, %v1206_v15  ;;  %v3345_v20 = vshrl.u32 %v721_v19, 7  ;;  %v2097_v19 = vld [vmem:[%s3797_s5 + $0xa8] sm:$0xff] }
 0x12a   : > { %622 = vst.msk [vmem:[#allocation2 + $0x68] sm:$0xff] %vm562_vm3, %v591_v28  ;;  %2462 = vmatprep.subr.bf16.mxu1 %v2461_v21  ;;  %v1169_v28 = vld [vmem:[#allocation5 + $0x2e0] sm:$0xff]  ;;  %2535 = vmatpush3.bf16.msra.mxu0 %v2534_v13 }
 0x12b   : > { %v2467_v30 = vpack.c.bf16 %v1171_v29, %v1169_v28  ;;  %v723_v21 = vsub.s32 0, %v3345_v20  ;;  %v727_v23 = vsub.s32 1, %v3345_v20  ;;  %2536 = vmatprep.subr.bf16.mxu0 %v2840_v12 }
 0x12c   : > { %v654_v35 = vpop.permute.xlu0 %653  ;;  %v695_v36 = vld [vmem:[#allocation2 + $0x60] sm:$0xff]  ;;  %v463_v37 = vpop.permute.xlu1 %462 }
 0x12d   : > { %682 = vst.msk [vmem:[#allocation2 + $0x68] sm:$0xff] %vm624_vm4, %v654_v35  ;;  %2088 = vmatmul.mubr.msk.f32.gmra.mrb[24].mxu0 %vm731_vm5, %v695_v36  ;;  %2464 = vmatpush1.bf16.msra.mxu1 %v2463_v24  ;;  %v1175_v35 = vld [vmem:[#allocation5 + $0x310] sm:$0xff]  ;;  %v3354_v26 = vrot.slane %v719_v22, %v723_v21 }
 0x12e   : > { %494 = vst.msk [vmem:[#allocation2 + $0x70] sm:$0xff] %vm419_vm1, %v463_v37  ;;  %922 = vmatprep.mubr.f32.mxu0 %v2835_v16  ;;  %2466 = vmatprep.subr.bf16.mxu1 %v2465_v27  ;;  %v2471_v36 = vpack.c.bf16 %v1175_v35, %v1173_v33  ;;  %v1178_v37 = vld [vmem:[#allocation5 + $0x328] sm:$0xff]  ;;  %v3358_v27 = vrot.slane %v719_v22, %v727_v23 }
 0x130   : > { %v526_v39 = vpop.permute.xlu0 %525  ;;  %v593_v40 = vpop.permute.xlu1 %592 }
 0x131   : > { %560 = vst.msk [vmem:[#allocation2 + $0x70] sm:$0xff] %vm545_vm2, %v526_v39  ;;  %2468 = vmatpush1.bf16.msra.mxu1 %v2467_v30  ;;  %v2473_v39 = vpack.c.bf16 %v1180_v38, %v1178_v37 }
 0x132   : > { %623 = vst.msk [vmem:[#allocation2 + $0x70] sm:$0xff] %vm562_vm3, %v593_v40  ;;  %2470 = vmatprep.subr.bf16.mxu1 %v2469_v34  ;;  %v1177_v40 = vld [vmem:[#allocation5 + $0x320] sm:$0xff] }
 0x133   : > { %625 = vst.msk [vmem:[#allocation2 + $0x70] sm:$0xff] %vm624_vm4, %v2835_v16 }
 0x134   : > { %v696_v41 = vld [vmem:[#allocation2 + $0x68] sm:$0xff]  ;;  %v465_v42 = vpop.permute.xlu0 %464  ;;  %v528_v43 = vpop.permute.xlu1 %527 }
 0x135   : > { %2089 = vmatmul.mubr.msk.f32.gmra.mrb[26].mxu0 %vm731_vm5, %v696_v41  ;;  %495 = vst.msk [vmem:[#allocation2 + $0x78] sm:$0xff] %vm419_vm1, %v465_v42  ;;  %2472 = vmatpush1.bf16.msra.mxu1 %v2471_v36  ;;  %v1179_v41 = vld [vmem:[#allocation5 + $0x330] sm:$0xff] }
 0x136   : > { %561 = vst.msk [vmem:[#allocation2 + $0x78] sm:$0xff] %vm545_vm2, %v528_v43  ;;  %928 = vmatprep.mubr.f32.mxu0 %v2835_v16  ;;  %v2475_v42 = vpack.c.bf16 %v1179_v41, %v1177_v40  ;;  %2474 = vmatprep.subr.bf16.mxu1 %v2473_v39  ;;  %v1182_v43 = vld [vmem:[#allocation5 + $0x348] sm:$0xff] }
 0x137   : > { %563 = vst.msk [vmem:[#allocation2 + $0x78] sm:$0xff] %vm562_vm3, %v2835_v16 }
 0x138   : > { %626 = vst.msk [vmem:[#allocation2 + $0x78] sm:$0xff] %vm624_vm4, %v2835_v16 }
 0x139   : > { %2476 = vmatpush1.bf16.msra.mxu1 %v2475_v42 }
 0x13a   : > { %v697_v44 = vld [vmem:[#allocation2 + $0x70] sm:$0xff] }
 0x13b   : > { %2090 = vmatmul.mubr.msk.f32.gmra.mrb[28].mxu0 %vm731_vm5, %v697_v44  ;;  %v1184_v44 = vld [vmem:[#allocation5 + $0x358] sm:$0xff] }
 0x13c   : > { %934 = vmatprep.mubr.f32.mxu0 %v2835_v16 }
 0x13f   : > { %v698_v45 = vld [vmem:[#allocation2 + $0x78] sm:$0xff] }
 0x140   : > { %2091 = vmatmul.mubr.msk.f32.gmra.mrb[30].mxu0 %vm731_vm5, %v698_v45  ;;  %v2477_v45 = vpack.c.bf16 %v1184_v44, %v1182_v43 }
 0x141   : > { %2245 = vmatprep.mubr.msk.f32.mxu0 %vm2841_vm6, %v2835_v16 }
 0x142   : > { %2478 = vmatprep.subr.bf16.mxu1 %v2477_v45 }
 0x143   : > { %2480 = vmatpush1.bf16.msra.mxu1 %v2479_v48 }
 0x144   : > { %2482 = vmatprep.subr.bf16.mxu1 %v2481_v51 }
 0x147   : > { %2484 = vmatpush1.bf16.msra.mxu1 %v2483_v54 }
 0x148   : > { %2486 = vmatprep.subr.bf16.mxu1 %v2485_v58 }
 0x14b   : > { %2488 = vmatpush1.bf16.msra.mxu1 %v2487_v60 }
 0x14c   : > { %2490 = vmatprep.subr.bf16.mxu1 %v2489_v63 }
 0x14f   : > { %2492 = vmatpush1.bf16.msra.mxu1 %v2491_v2 }
 0x150   : > { %2494 = vmatprep.subr.bf16.mxu1 %v2493_v5 }
 0x153   : > { %2496 = vmatpush1.bf16.msra.mxu1 %v2495_v8 }
 0x154   : > { %2498 = vmatprep.subr.bf16.mxu1 %v2497_v11  ;;  %v2094_v11 = vld [vmem:[%s3797_s5 + $0x90] sm:$0xff] }
 0x157   : > { %2500 = vmatpush1.bf16.msra.mxu1 %v2499_v14  ;;  %v2095_v14 = vld [vmem:[%s3797_s5 + $0x98] sm:$0xff] }
 0x158   : > { %2502 = vmatprep.subr.bf16.mxu1 %v2501_v18  ;;  %v2537_v15 = vpack.c.bf16 %v2095_v14, %v2094_v11  ;;  %v2096_v18 = vld [vmem:[%s3797_s5 + $0xa0] sm:$0xff] }
 0x15a   : > { %2538 = vmatpush3.bf16.msra.mxu0 %v2537_v15 }
 0x15b   : > { %2539 = vmatprep.subr.bf16.mxu0 %v2840_v12 }
 0x1a2   : > { %v846_v24 = vpop.f32.mrb[0].mxu0 }
 0x1a3   : > { %v848_v25 = vpop.f32.mrb[1].mxu0  ;;  %v847_v28 = vadd.f32 %v846_v24, %v3354_v26 }
 0x1a4   : > { %v849_v29 = vadd.f32 %v848_v25, %v3358_v27 }
 0x1a5   : > { %v941_v34 = vmax.f32 %v847_v28, 0.0 }
 0x1a6   : > { %v942_v36 = vmax.f32 %v849_v29, 0.0 }
 0x1a8   : > { %v852_v30 = vpop.f32.mrb[2].mxu0 }
 0x1a9   : > { %v853_v31 = vadd.f32 %v852_v30, %v3354_v26  ;;  %v854_v32 = vpop.f32.mrb[3].mxu0  ;;  %v2540_v30 = vpack.c.bf16 %v2097_v19, %v2096_v18 }
 0x1aa   : > { %v855_v33 = vadd.f32 %v854_v32, %v3358_v27 }
 0x1ab   : > { %v943_v35 = vmax.f32 %v853_v31, 0.0  ;;  %2541 = vmatpush3.bf16.msra.mxu0 %v2540_v30 }
 0x1ac   : > { %v944_v37 = vmax.f32 %v855_v33, 0.0  ;;  %v2098_v33 = vld [vmem:[%s3797_s5 + $0xb0] sm:$0xff]  ;;  %2542 = vmatprep.subr.bf16.mxu0 %v2840_v12 }
 0x1ad   : > { %v973_v38 = vmax.f32 %v941_v34, %v943_v35  ;;  %v2099_v34 = vld [vmem:[%s3797_s5 + $0xb8] sm:$0xff] }
 0x1ae   : > { %v974_v39 = vmax.f32 %v942_v36, %v944_v37 }
 0x1b0   : > { %v858_v40 = vpop.f32.mrb[4].mxu0  ;;  %v3364_v41 = vmax.f32 %v973_v38, %v974_v39  ;;  %v2543_v39 = vpack.c.bf16 %v2099_v34, %v2098_v33 }
 0x1b1   : > { %v860_v42 = vpop.f32.mrb[5].mxu0  ;;  %v859_v43 = vadd.f32 %v858_v40, %v3354_v26  ;;  %v2100_v40 = vld [vmem:[%s3797_s5 + $0xc0] sm:$0xff] }
 0x1b2   : > { %1319 = vmatprep.mubr.f32.mxu1 %v3364_v41  ;;  %v861_v44 = vadd.f32 %v860_v42, %v3358_v27  ;;  %v2101_v42 = vld [vmem:[%s3797_s5 + $0xc8] sm:$0xff]  ;;  %2544 = vmatpush3.bf16.msra.mxu0 %v2543_v39 }
 0x1b3   : > { %1320 = vmatmul.mubr.f32.gmra.mrb[2].mxu1 %v2835_v16  ;;  %v945_v49 = vmax.f32 %v859_v43, 0.0  ;;  %2545 = vmatprep.subr.bf16.mxu0 %v2840_v12 }
 0x1b4   : > { %v946_v51 = vmax.f32 %v861_v44, 0.0 }
 0x1b8   : > { %v864_v45 = vpop.f32.mrb[6].mxu0 }
 0x1b9   : > { %v865_v46 = vadd.f32 %v864_v45, %v3354_v26  ;;  %v866_v47 = vpop.f32.mrb[7].mxu0 }
 0x1ba   : > { %v867_v48 = vadd.f32 %v866_v47, %v3358_v27  ;;  %v2102_v47 = vld [vmem:[%s3797_s5 + $0xd0] sm:$0xff] }
 0x1bb   : > { %v947_v50 = vmax.f32 %v865_v46, 0.0  ;;  %v2546_v46 = vpack.c.bf16 %v2101_v42, %v2100_v40  ;;  %v1205_v42 = vld [vmem:[#allocation5 + $0x400] sm:$0xff] }
 0x1bc   : > { %v948_v52 = vmax.f32 %v867_v48, 0.0  ;;  %v2103_v48 = vld [vmem:[%s3797_s5 + $0xd8] sm:$0xff] }
 0x1bd   : > { %v975_v53 = vmax.f32 %v945_v49, %v947_v50  ;;  %2547 = vmatpush3.bf16.msra.mxu0 %v2546_v46  ;;  %v2549_v49 = vpack.c.bf16 %v2103_v48, %v2102_v47  ;;  %v1210_v46 = vld [vmem:[#allocation5 + $0x428] sm:$0xff]  ;;  %v1212_v47 = vld [vmem:[#allocation5 + $0x438] sm:$0xff] }
 0x1be   : > { %v976_v54 = vmax.f32 %v946_v51, %v948_v52  ;;  %2548 = vmatprep.subr.bf16.mxu0 %v2840_v12 }
 0x1c0   : > { %v3372_v55 = vmax.f32 %v975_v53, %v976_v54  ;;  %v870_v56 = vpop.f32.mrb[8].mxu0 }
 0x1c1   : > { %v872_v57 = vpop.f32.mrb[9].mxu0  ;;  %v871_v58 = vadd.f32 %v870_v56, %v3354_v26  ;;  %2550 = vmatpush3.bf16.msra.mxu0 %v2549_v49 }
 0x1c2   : > { %1325 = vmatprep.mubr.f32.mxu1 %v3372_v55  ;;  %v873_v59 = vadd.f32 %v872_v57, %v3358_v27  ;;  %2551 = vmatprep.subr.bf16.mxu0 %v2840_v12 }
 0x1c3   : > { %1326 = vmatmul.mubr.f32.gmra.mrb[4].mxu1 %v3364_v41  ;;  %v949_v0 = vmax.f32 %v871_v58, 0.0 }
 0x1c4   : > { %v950_v2 = vmax.f32 %v873_v59, 0.0 }
 0x1c8   : > { %v876_v60 = vpop.f32.mrb[10].mxu0 }
 0x1c9   : > { %v877_v61 = vadd.f32 %v876_v60, %v3354_v26  ;;  %v878_v62 = vpop.f32.mrb[11].mxu0 }
 0x1ca   : > { %v879_v63 = vadd.f32 %v878_v62, %v3358_v27 }
 0x1cb   : > { %v951_v1 = vmax.f32 %v877_v61, 0.0 }
 0x1cc   : > { %v952_v3 = vmax.f32 %v879_v63, 0.0 }
 0x1cd   : > { %v977_v4 = vmax.f32 %v949_v0, %v951_v1 }
 0x1ce   : > { %v978_v5 = vmax.f32 %v950_v2, %v952_v3 }
 0x1d0   : > { %v3380_v6 = vmax.f32 %v977_v4, %v978_v5  ;;  %v882_v7 = vpop.f32.mrb[12].mxu0 }
 0x1d1   : > { %v884_v8 = vpop.f32.mrb[13].mxu0  ;;  %v883_v17 = vadd.f32 %v882_v7, %v3354_v26 }
 0x1d2   : > { %1331 = vmatprep.mubr.f32.mxu1 %v3380_v6  ;;  %v885_v22 = vadd.f32 %v884_v8, %v3358_v27 }
 0x1d3   : > { %1332 = vmatmul.mubr.f32.gmra.mrb[6].mxu1 %v3372_v55  ;;  %v953_v31 = vmax.f32 %v883_v17, 0.0 }
 0x1d4   : > { %v954_v35 = vmax.f32 %v885_v22, 0.0 }
 0x1d8   : > { %v888_v24 = vpop.f32.mrb[14].mxu0 }
 0x1d9   : > { %v889_v25 = vadd.f32 %v888_v24, %v3354_v26  ;;  %v890_v28 = vpop.f32.mrb[15].mxu0 }
 0x1da   : > { %v891_v29 = vadd.f32 %v890_v28, %v3358_v27 }
 0x1db   : > { %v955_v32 = vmax.f32 %v889_v25, 0.0 }
 0x1dc   : > { %v956_v36 = vmax.f32 %v891_v29, 0.0 }
 0x1dd   : > { %v979_v37 = vmax.f32 %v953_v31, %v955_v32 }
 0x1de   : > { %v980_v38 = vmax.f32 %v954_v35, %v956_v36 }
 0x1e0   : > { %v3422_v43 = vmax.f32 %v979_v37, %v980_v38  ;;  %v894_v44 = vpop.f32.mrb[16].mxu0 }
 0x1e1   : > { %v896_v45 = vpop.f32.mrb[17].mxu0  ;;  %v895_v50 = vadd.f32 %v894_v44, %v3354_v26  ;;  %v1207_v44 = vld [vmem:[#allocation5 + $0x410] sm:$0xff] }
 0x1e2   : > { %1337 = vmatprep.mubr.f32.mxu1 %v3422_v43  ;;  %v897_v51 = vadd.f32 %v896_v45, %v3358_v27  ;;  %v2503_v49 = vpack.c.bf16 %v1207_v44, %v1205_v42  ;;  %v1233_v42 = vld [vmem:[#allocation5 + $0x4e0] sm:$0xff]  ;;  %v1235_v44 = vld [vmem:[#allocation5 + $0x4f0] sm:$0xff] }
 0x1e3   : > { %1338 = vmatmul.mubr.f32.gmra.mrb[8].mxu1 %v3380_v6  ;;  %v957_v57 = vmax.f32 %v895_v50, 0.0 }
 0x1e4   : > { %v958_v59 = vmax.f32 %v897_v51, 0.0 }
 0x1e8   : > { %v900_v52 = vpop.f32.mrb[18].mxu0 }
 0x1e9   : > { %v901_v53 = vadd.f32 %v900_v52, %v3354_v26  ;;  %v902_v54 = vpop.f32.mrb[19].mxu0 }
 0x1ea   : > { %v903_v56 = vadd.f32 %v902_v54, %v3358_v27  ;;  %v1209_v54 = vld [vmem:[#allocation5 + $0x420] sm:$0xff] }
 0x1eb   : > { %v959_v58 = vmax.f32 %v901_v53, 0.0  ;;  %v2505_v53 = vpack.c.bf16 %v1212_v47, %v1210_v46  ;;  %v1237_v47 = vld [vmem:[%s3796_s4] sm:$0x3] }
 0x1ec   : > { %v960_v60 = vmax.f32 %v903_v56, 0.0  ;;  %v1211_v56 = vld [vmem:[#allocation5 + $0x430] sm:$0xff] }
 0x1ed   : > { %v981_v61 = vmax.f32 %v957_v57, %v959_v58 }
 0x1ee   : > { %v982_v62 = vmax.f32 %v958_v59, %v960_v60  ;;  %v1214_v59 = vld [vmem:[#allocation5 + $0x448] sm:$0xff]  ;;  %v1216_v60 = vld [vmem:[#allocation5 + $0x458] sm:$0xff] }
 0x1f0   : > { %v3439_v63 = vmax.f32 %v981_v61, %v982_v62  ;;  %v906_v0 = vpop.f32.mrb[20].mxu0 }
 0x1f1   : > { %v908_v1 = vpop.f32.mrb[21].mxu0  ;;  %v907_v2 = vadd.f32 %v906_v0, %v3354_v26  ;;  %v2507_v0 = vpack.c.bf16 %v1211_v56, %v1209_v54 }
 0x1f2   : > { %1343 = vmatprep.mubr.f32.mxu1 %v3439_v63  ;;  %v909_v3 = vadd.f32 %v908_v1, %v3358_v27 }
 0x1f3   : > { %1344 = vmatmul.mubr.f32.gmra.mrb[10].mxu1 %v3422_v43  ;;  %v961_v9 = vmax.f32 %v907_v2, 0.0  ;;  %v1213_v2 = vld [vmem:[#allocation5 + $0x440] sm:$0xff] }
 0x1f4   : > { %v962_v11 = vmax.f32 %v909_v3, 0.0  ;;  %v1215_v3 = vld [vmem:[#allocation5 + $0x450] sm:$0xff] }
 0x1f8   : > { %v912_v4 = vpop.f32.mrb[22].mxu0 }
 0x1f9   : > { %v913_v5 = vadd.f32 %v912_v4, %v3354_v26  ;;  %v914_v7 = vpop.f32.mrb[23].mxu0 }
 0x1fa   : > { %v915_v8 = vadd.f32 %v914_v7, %v3358_v27  ;;  %v1220_v7 = vld [vmem:[#allocation5 + $0x478] sm:$0xff] }
 0x1fb   : > { %v963_v10 = vmax.f32 %v913_v5, 0.0  ;;  %v1218_v5 = vld [vmem:[#allocation5 + $0x468] sm:$0xff] }
 0x1fc   : > { %v964_v13 = vmax.f32 %v915_v8, 0.0  ;;  %v2513_v8 = vpack.c.bf16 %v1220_v7, %v1218_v5 }
 0x1fd   : > { %v983_v14 = vmax.f32 %v961_v9, %v963_v10  ;;  %v1217_v9 = vld [vmem:[#allocation5 + $0x460] sm:$0xff]  ;;  %v1219_v10 = vld [vmem:[#allocation5 + $0x470] sm:$0xff] }
 0x1fe   : > { %v984_v15 = vmax.f32 %v962_v11, %v964_v13  ;;  %v1222_v11 = vld [vmem:[#allocation5 + $0x488] sm:$0xff]  ;;  %v1224_v13 = vld [vmem:[#allocation5 + $0x498] sm:$0xff] }
 0x200   : > { %v3447_v17 = vmax.f32 %v983_v14, %v984_v15  ;;  %v918_v18 = vpop.f32.mrb[24].mxu0  ;;  %v2515_v14 = vpack.c.bf16 %v1219_v10, %v1217_v9  ;;  %v1221_v15 = vld [vmem:[#allocation5 + $0x480] sm:$0xff] }
 0x201   : > { %v920_v19 = vpop.f32.mrb[25].mxu0  ;;  %v919_v22 = vadd.f32 %v918_v18, %v3354_v26  ;;  %v1223_v18 = vld [vmem:[#allocation5 + $0x490] sm:$0xff] }
 0x202   : > { %1349 = vmatprep.mubr.f32.mxu1 %v3447_v17  ;;  %v921_v24 = vadd.f32 %v920_v19, %v3358_v27  ;;  %v1226_v19 = vld [vmem:[#allocation5 + $0x4a8] sm:$0xff] }
 0x203   : > { %1350 = vmatmul.mubr.f32.gmra.mrb[12].mxu1 %v3439_v63  ;;  %v965_v31 = vmax.f32 %v919_v22, 0.0  ;;  %v1228_v22 = vld [vmem:[#allocation5 + $0x4b8] sm:$0xff] }
 0x204   : > { %v966_v33 = vmax.f32 %v921_v24, 0.0  ;;  %v2519_v24 = vpack.c.bf16 %v1223_v18, %v1221_v15 }
 0x208   : > { %v924_v25 = vpop.f32.mrb[26].mxu0 }
 0x209   : > { %v925_v28 = vadd.f32 %v924_v25, %v3354_v26  ;;  %v926_v29 = vpop.f32.mrb[27].mxu0  ;;  %v2521_v25 = vpack.c.bf16 %v1228_v22, %v1226_v19 }
 0x20a   : > { %v927_v30 = vadd.f32 %v926_v29, %v3358_v27  ;;  %v1227_v29 = vld [vmem:[#allocation5 + $0x4b0] sm:$0xff] }
 0x20b   : > { %v967_v32 = vmax.f32 %v925_v28, 0.0  ;;  %v1225_v28 = vld [vmem:[#allocation5 + $0x4a0] sm:$0xff] }
 0x20c   : > { %v968_v34 = vmax.f32 %v927_v30, 0.0  ;;  %v1230_v30 = vld [vmem:[#allocation5 + $0x4c8] sm:$0xff] }
 0x20d   : > { %v985_v35 = vmax.f32 %v965_v31, %v967_v32  ;;  %v1232_v31 = vld [vmem:[#allocation5 + $0x4d8] sm:$0xff]  ;;  %v2523_v32 = vpack.c.bf16 %v1227_v29, %v1225_v28  ;;  %v1618_v28 = vld [vmem:[%s3797_s5 + $0x10] sm:$0xff] }
 0x20e   : > { %v986_v36 = vmax.f32 %v966_v33, %v968_v34  ;;  %v930_v37 = vpop.f32.mrb[28].mxu0  ;;  %v2525_v33 = vpack.c.bf16 %v1232_v31, %v1230_v30  ;;  %v1229_v34 = vld [vmem:[#allocation5 + $0x4c0] sm:$0xff]  ;;  %v1619_v29 = vld [vmem:[%s3797_s5 + $0x18] sm:$0xff] }
 0x20f   : > { %v932_v38 = vpop.f32.mrb[29].mxu0  ;;  %v931_v40 = vadd.f32 %v930_v37, %v3354_v26  ;;  %v1236_v37 = vld [vmem:[#allocation5 + $0x4f8] sm:$0xff] }
 0x210   : > { %v3455_v39 = vmax.f32 %v985_v35, %v986_v36  ;;  %v933_v45 = vadd.f32 %v932_v38, %v3358_v27  ;;  %v1231_v35 = vld [vmem:[#allocation5 + $0x4d0] sm:$0xff]  ;;  %v1234_v36 = vld [vmem:[#allocation5 + $0x4e8] sm:$0xff] }
 0x211   : > { %v969_v50 = vmax.f32 %v931_v40, 0.0  ;;  %v2527_v38 = vpack.c.bf16 %v1231_v35, %v1229_v34  ;;  %v2529_v40 = vpack.c.bf16 %v1236_v37, %v1234_v36  ;;  %v2561_v35 = vpack.c.bf16 %v1619_v29, %v1618_v28  ;;  %v2119_v28 = vld [vmem:[%s3797_s5 + $0x158] sm:$0xff] }
 0x212   : > { %1355 = vmatprep.mubr.f32.mxu1 %v3455_v39  ;;  %v970_v57 = vmax.f32 %v933_v45, 0.0  ;;  %v2531_v45 = vpack.c.bf16 %v1235_v44, %v1233_v42  ;;  %v1621_v42 = vld [vmem:[%s3797_s5 + $0x28] sm:$0xff] }
 0x213   : > { %1356 = vmatmul.mubr.f32.gmra.mrb[14].mxu1 %v3447_v17  ;;  %v936_v48 = vpop.f32.mrb[30].mxu0 }
 0x214   : > { %1426 = vmatprep.mubr.f32.mxu1 %v3372_v55  ;;  %v937_v51 = vadd.f32 %v936_v48, %v3354_v26  ;;  %v938_v52 = vpop.f32.mrb[31].mxu0  ;;  %v2509_v26 = vpack.c.bf16 %v1216_v60, %v1214_v59  ;;  %v3518_v48 = vrot.slane %v1237_v47, %v723_v21 }
 0x215   : > { %v939_v58 = vadd.f32 %v938_v52, %v3358_v27 }
 0x216   : > { %v971_v61 = vmax.f32 %v937_v51, 0.0 }
 0x217   : > { %1427 = vmatmul.mubr.f32.vlgmr.msra.gmra.mrb[0].mxu1 %v3364_v41  ;;  %v972_v62 = vmax.f32 %v939_v58, 0.0  ;;  %v2511_v41 = vpack.c.bf16 %v1215_v3, %v1213_v2 }
 0x218   : > { %2504 = vmatpush1.bf16.msra.mxu1 %v2503_v49  ;;  %1432 = vmatprep.mubr.f32.mxu1 %v3380_v6  ;;  %v987_v1 = vmax.f32 %v969_v50, %v971_v61  ;;  %v3522_v50 = vrot.slane %v1237_v47, %v727_v23  ;;  %v1622_v47 = vld [vmem:[%s3797_s5 + $0x30] sm:$0xff] }
 0x219   : > { %2506 = vmatprep.subr.bf16.mxu1 %v2505_v53  ;;  %v988_v4 = vmax.f32 %v970_v57, %v972_v62 }
 0x21b   : > { %1433 = vmatmul.mubr.f32.gmra.mrb[2].mxu1 %v3372_v55  ;;  %v3467_v27 = vmax.f32 %v987_v1, %v988_v4  ;;  %v2517_v55 = vpack.c.bf16 %v1224_v13, %v1222_v11  ;;  %v1616_v11 = vld [vmem:[%s3797_s5] sm:$0xff]  ;;  %v1617_v13 = vld [vmem:[%s3797_s5 + $0x8] sm:$0xff] }
 0x21c   : > { %2508 = vmatpush1.bf16.msra.mxu1 %v2507_v0  ;;  %1438 = vmatprep.mubr.f32.mxu1 %v3422_v43  ;;  %v2558_v22 = vpack.c.bf16 %v1617_v13, %v1616_v11  ;;  %v2110_v11 = vld [vmem:[%s3797_s5 + $0x110] sm:$0xff]  ;;  %v2111_v13 = vld [vmem:[%s3797_s5 + $0x118] sm:$0xff] }
 0x21d   : > { %2510 = vmatprep.subr.bf16.mxu1 %v2509_v26 }
 0x21f   : > { %1439 = vmatmul.mubr.f32.gmra.mrb[4].mxu1 %v3380_v6 }
 0x220   : > { %2512 = vmatpush1.bf16.msra.mxu1 %v2511_v41  ;;  %1444 = vmatprep.mubr.f32.mxu1 %v3439_v63 }
 0x221   : > { %2514 = vmatprep.subr.bf16.mxu1 %v2513_v8 }
 0x223   : > { %1445 = vmatmul.mubr.f32.gmra.mrb[6].mxu1 %v3422_v43 }
 0x224   : > { %2516 = vmatpush1.bf16.msra.mxu1 %v2515_v14  ;;  %1450 = vmatprep.mubr.f32.mxu1 %v3447_v17 }
 0x225   : > { %2518 = vmatprep.subr.bf16.mxu1 %v2517_v55 }
 0x227   : > { %1451 = vmatmul.mubr.f32.gmra.mrb[8].mxu1 %v3439_v63 }
 0x228   : > { %2520 = vmatpush1.bf16.msra.mxu1 %v2519_v24  ;;  %1456 = vmatprep.mubr.f32.mxu1 %v3455_v39 }
 0x229   : > { %2522 = vmatprep.subr.bf16.mxu1 %v2521_v25 }
 0x22b   : > { %1457 = vmatmul.mubr.f32.gmra.mrb[10].mxu1 %v3447_v17 }
 0x22c   : > { %2524 = vmatpush1.bf16.msra.mxu1 %v2523_v32  ;;  %1462 = vmatprep.mubr.f32.mxu1 %v3467_v27 }
 0x22d   : > { %2526 = vmatprep.subr.bf16.mxu1 %v2525_v33 }
 0x22f   : > { %1463 = vmatmul.mubr.f32.gmra.mrb[12].mxu1 %v3455_v39 }
 0x230   : > { %2528 = vmatpush1.bf16.msra.mxu1 %v2527_v38  ;;  %1468 = vmatprep.mubr.f32.mxu1 %v2835_v16 }
 0x231   : > { %2530 = vmatprep.subr.bf16.mxu1 %v2529_v40  ;;  %v1620_v40 = vld [vmem:[%s3797_s5 + $0x20] sm:$0xff] }
 0x233   : > { %1469 = vmatmul.mubr.f32.gmra.mrb[14].mxu1 %v3467_v27 }
 0x234   : > { %2532 = vmatpush1.bf16.msra.mxu1 %v2531_v45  ;;  %1539 = vmatprep.mubr.f32.mxu1 %v2835_v16 }
 0x237   : > { %1540 = vmatmul.mubr.f32.vlgmr.msra.gmra.mrb[0].mxu1 %v3380_v6  ;;  %v2104_v6 = vld [vmem:[%s3797_s5 + $0xe0] sm:$0xff] }
 0x238   : > { %1545 = vmatprep.mubr.f32.mxu1 %v2835_v16 }
 0x23b   : > { %1546 = vmatmul.mubr.f32.gmra.mrb[2].mxu1 %v3422_v43  ;;  %v2105_v43 = vld [vmem:[%s3797_s5 + $0xe8] sm:$0xff] }
 0x23c   : > { %1551 = vmatprep.mubr.f32.mxu1 %v2835_v16 }
 0x23f   : > { %1552 = vmatmul.mubr.f32.gmra.mrb[4].mxu1 %v3439_v63  ;;  %v2552_v63 = vpack.c.bf16 %v2105_v43, %v2104_v6 }
 0x240   : > { %1557 = vmatprep.mubr.f32.mxu1 %v2835_v16 }
 0x241   : > { %2553 = vmatpush3.bf16.msra.mxu0 %v2552_v63 }
 0x242   : > { %2554 = vmatprep.subr.bf16.mxu0 %v2840_v12 }
 0x243   : > { %1558 = vmatmul.mubr.f32.gmra.mrb[6].mxu1 %v3447_v17  ;;  %v2106_v17 = vld [vmem:[%s3797_s5 + $0xf0] sm:$0xff] }
 0x244   : > { %1563 = vmatprep.mubr.f32.mxu1 %v2835_v16 }
 0x247   : > { %1564 = vmatmul.mubr.f32.gmra.mrb[8].mxu1 %v3455_v39  ;;  %v2107_v39 = vld [vmem:[%s3797_s5 + $0xf8] sm:$0xff] }
 0x248   : > { %1569 = vmatprep.mubr.f32.mxu1 %v2835_v16  ;;  %v2555_v46 = vpack.c.bf16 %v2107_v39, %v2106_v17  ;;  %v2564_v17 = vpack.c.bf16 %v1621_v42, %v1620_v40  ;;  %v2126_v40 = vld [vmem:[%s3797_s5 + $0x190] sm:$0xff]  ;;  %v2127_v42 = vld [vmem:[%s3797_s5 + $0x198] sm:$0xff] }
 0x24a   : > { %2556 = vmatpush3.bf16.msra.mxu0 %v2555_v46 }
 0x24b   : > { %1570 = vmatmul.mubr.f32.gmra.mrb[10].mxu1 %v3467_v27  ;;  %2557 = vmatprep.subr.bf16.mxu0 %v2840_v12 }
 0x24c   : > { %1575 = vmatprep.mubr.f32.mxu1 %v2835_v16 }
 0x24f   : > { %1576 = vmatmul.mubr.f32.gmra.mrb[12].mxu1 %v2835_v16 }
 0x250   : > { %1581 = vmatprep.mubr.f32.mxu1 %v2835_v16 }
 0x253   : > { %1582 = vmatmul.mubr.f32.gmra.mrb[14].mxu1 %v2835_v16 }
 0x30a   : > { %v1541_v49 = vpop.f32.mrb[0].mxu1 }
 0x30b   : > { %v1543_v51 = vpop.f32.mrb[1].mxu1  ;;  %v2629_v52 = vadd.f32 %v1541_v49, %v3518_v48  ;;  %v1623_v49 = vld [vmem:[%s3797_s5 + $0x38] sm:$0xff] }
 0x30c   : > { %v2630_v53 = vadd.f32 %v1543_v51, %v3522_v50 }
 0x30d   : > { %v1588_v59 = vmax.f32 %v2629_v52, 0.0 }
 0x30e   : > { %v1547_v54 = vpop.f32.mrb[2].mxu1  ;;  %v1589_v21 = vmax.f32 %v2630_v53, 0.0 }
 0x30f   : > { %v2631_v56 = vadd.f32 %v1547_v54, %v3518_v48  ;;  %v1549_v57 = vpop.f32.mrb[3].mxu1 }
 0x310   : > { %v2632_v58 = vadd.f32 %v1549_v57, %v3522_v50  ;;  %v2567_v57 = vpack.c.bf16 %v1623_v49, %v1622_v47  ;;  %v2134_v49 = vld [vmem:[%s3797_s5 + $0x1d0] sm:$0xff] }
 0x311   : > { %v1590_v60 = vmax.f32 %v2631_v56, 0.0 }
 0x312   : > { %v1591_v61 = vmax.f32 %v2632_v58, 0.0  ;;  %v1553_v62 = vpop.f32.mrb[4].mxu1 }
 0x313   : > { %v3528_v0 = vmax.f32 %v1588_v59, %v1590_v60  ;;  %v1555_v20 = vpop.f32.mrb[5].mxu1  ;;  %v2633_v1 = vadd.f32 %v1553_v62, %v3518_v48  ;;  %v1624_v60 = vld [vmem:[%s3797_s5 + $0x40] sm:$0xff] }
 0x314   : > { %v3530_v23 = vmax.f32 %v1589_v21, %v1591_v61  ;;  %v2634_v2 = vadd.f32 %v1555_v20, %v3522_v50  ;;  %v1625_v21 = vld [vmem:[%s3797_s5 + $0x48] sm:$0xff]  ;;  %v1626_v20 = vld [vmem:[%s3797_s5 + $0x50] sm:$0xff] }
 0x315   : > { %v1592_v27 = vmax.f32 %v2633_v1, 0.0  ;;  %v1627_v1 = vld [vmem:[%s3797_s5 + $0x58] sm:$0xff] }
 0x316   : > { %v1612_v26 = vmax.f32 %v3528_v0, %v3530_v23  ;;  %v1559_v3 = vpop.f32.mrb[6].mxu1  ;;  %v1593_v8 = vmax.f32 %v2634_v2, 0.0  ;;  %v2573_v2 = vpack.c.bf16 %v1627_v1, %v1626_v20  ;;  %v2114_v0 = vld [vmem:[%s3797_s5 + $0x130] sm:$0xff]  ;;  %v2115_v23 = vld [vmem:[%s3797_s5 + $0x138] sm:$0xff] }
 0x317   : > { %v2635_v4 = vadd.f32 %v1559_v3, %v3518_v48  ;;  %v1561_v5 = vpop.f32.mrb[7].mxu1  ;;  %v1628_v3 = vld [vmem:[%s3797_s5 + $0x60] sm:$0xff] }
 0x318   : > { %v2636_v7 = vadd.f32 %v1561_v5, %v3522_v50 }
 0x319   : > { %v1594_v41 = vmax.f32 %v2635_v4, 0.0  ;;  %v1629_v4 = vld [vmem:[%s3797_s5 + $0x68] sm:$0xff] }
 0x31a   : > { %v1595_v9 = vmax.f32 %v2636_v7, 0.0  ;;  %v1565_v10 = vpop.f32.mrb[8].mxu1  ;;  %v2576_v5 = vpack.c.bf16 %v1629_v4, %v1628_v3  ;;  %v1630_v7 = vld [vmem:[%s3797_s5 + $0x70] sm:$0xff] }
 0x31b   : > { %v1606_v14 = vmax.f32 %v1592_v27, %v1594_v41  ;;  %v2637_v55 = vadd.f32 %v1565_v10, %v3518_v48  ;;  %v1567_v15 = vpop.f32.mrb[9].mxu1  ;;  %v1631_v27 = vld [vmem:[%s3797_s5 + $0x78] sm:$0xff] }
 0x31c   : > { %v1607_v18 = vmax.f32 %v1593_v8, %v1595_v9  ;;  %v2638_v19 = vadd.f32 %v1567_v15, %v3522_v50  ;;  %v2579_v41 = vpack.c.bf16 %v1631_v27, %v1630_v7  ;;  %v2108_v8 = vld [vmem:[%s3797_s5 + $0x100] sm:$0xff]  ;;  %v2109_v9 = vld [vmem:[%s3797_s5 + $0x108] sm:$0xff] }
 0x31d   : > { %v1596_v33 = vmax.f32 %v2637_v55, 0.0  ;;  %v2582_v10 = vpack.c.bf16 %v2109_v9, %v2108_v8  ;;  %v2112_v55 = vld [vmem:[%s3797_s5 + $0x120] sm:$0xff]  ;;  %v2113_v15 = vld [vmem:[%s3797_s5 + $0x128] sm:$0xff] }
 0x31e   : > { %v1613_v24 = vmax.f32 %v1606_v14, %v1607_v18  ;;  %v1571_v25 = vpop.f32.mrb[10].mxu1  ;;  %v1597_v36 = vmax.f32 %v2638_v19, 0.0  ;;  %v2585_v14 = vpack.c.bf16 %v2111_v13, %v2110_v11  ;;  %v2588_v18 = vpack.c.bf16 %v2113_v15, %v2112_v55  ;;  %v2116_v19 = vld [vmem:[%s3797_s5 + $0x140] sm:$0xff] }
 0x31f   : > { %v2639_v30 = vadd.f32 %v1571_v25, %v3518_v48  ;;  %v1573_v31 = vpop.f32.mrb[11].mxu1  ;;  %v2118_v25 = vld [vmem:[%s3797_s5 + $0x150] sm:$0xff] }
 0x320   : > { %v2640_v32 = vadd.f32 %v1573_v31, %v3522_v50  ;;  %2246 = vmatmul.mubr.f32.vlgmr.msra.gmra.mrb[32].mxu0 %v1613_v24  ;;  %v2597_v29 = vpack.c.bf16 %v2119_v28, %v2118_v25  ;;  %v2121_v31 = vld [vmem:[%s3797_s5 + $0x168] sm:$0xff] }
 0x321   : > { %v1598_v34 = vmax.f32 %v2639_v30, 0.0  ;;  %2559 = vmatpush3.bf16.msra.mxu0 %v2558_v22  ;;  %2280 = vmatprep.mubr.msk.f32.mxu0 %vm2841_vm6, %v2835_v16  ;;  %v2117_v22 = vld [vmem:[%s3797_s5 + $0x148] sm:$0xff]  ;;  %v2120_v30 = vld [vmem:[%s3797_s5 + $0x160] sm:$0xff] }
 0x322   : > { %v1599_v37 = vmax.f32 %v2640_v32, 0.0  ;;  %v1577_v38 = vpop.f32.mrb[12].mxu1  ;;  %2560 = vmatprep.subr.bf16.mxu0 %v2840_v12  ;;  %v2594_v24 = vpack.c.bf16 %v2117_v22, %v2116_v19  ;;  %v2600_v32 = vpack.c.bf16 %v2121_v31, %v2120_v30 }
 0x323   : > { %v3563_v44 = vmax.f32 %v1596_v33, %v1598_v34  ;;  %v2641_v45 = vadd.f32 %v1577_v38, %v3518_v48  ;;  %v1579_v6 = vpop.f32.mrb[13].mxu1  ;;  %v2122_v33 = vld [vmem:[%s3797_s5 + $0x170] sm:$0xff]  ;;  %v2123_v34 = vld [vmem:[%s3797_s5 + $0x178] sm:$0xff] }
 0x324   : > { %v3566_v43 = vmax.f32 %v1597_v36, %v1599_v37  ;;  %v2642_v63 = vadd.f32 %v1579_v6, %v3522_v50  ;;  %v2124_v36 = vld [vmem:[%s3797_s5 + $0x180] sm:$0xff]  ;;  %v2125_v37 = vld [vmem:[%s3797_s5 + $0x188] sm:$0xff] }
 0x325   : > { %2562 = vmatpush3.bf16.msra.mxu0 %v2561_v35  ;;  %v1600_v54 = vmax.f32 %v2641_v45, 0.0  ;;  %v2603_v35 = vpack.c.bf16 %v2123_v34, %v2122_v33  ;;  %v2606_v38 = vpack.c.bf16 %v2125_v37, %v2124_v36  ;;  %v2609_v45 = vpack.c.bf16 %v2127_v42, %v2126_v40  ;;  %v2128_v6 = vld [vmem:[%s3797_s5 + $0x1a0] sm:$0xff] }
 0x326   : > { %v1614_v39 = vmax.f32 %v3563_v44, %v3566_v43  ;;  %v1583_v46 = vpop.f32.mrb[14].mxu1  ;;  %2563 = vmatprep.subr.bf16.mxu0 %v2840_v12  ;;  %v1601_v58 = vmax.f32 %v2642_v63, 0.0  ;;  %v2129_v63 = vld [vmem:[%s3797_s5 + $0x1a8] sm:$0xff]  ;;  %v2130_v44 = vld [vmem:[%s3797_s5 + $0x1b0] sm:$0xff] }
 0x327   : > { %v2643_v51 = vadd.f32 %v1583_v46, %v3518_v48  ;;  %v1585_v52 = vpop.f32.mrb[15].mxu1  ;;  %v2133_v46 = vld [vmem:[%s3797_s5 + $0x1c8] sm:$0xff] }
 0x328   : > { %v2644_v53 = vadd.f32 %v1585_v52, %v3522_v50  ;;  %v2570_v50 = vpack.c.bf16 %v1625_v21, %v1624_v60 }
 0x329   : > { %v1602_v56 = vmax.f32 %v2643_v51, 0.0  ;;  %2565 = vmatpush3.bf16.msra.mxu0 %v2564_v17  ;;  %v2612_v17 = vpack.c.bf16 %v2129_v63, %v2128_v6  ;;  %v2135_v51 = vld [vmem:[%s3797_s5 + $0x1d8] sm:$0xff] }
 0x32a   : > { %v1603_v59 = vmax.f32 %v2644_v53, 0.0  ;;  %2566 = vmatprep.subr.bf16.mxu0 %v2840_v12  ;;  %v2621_v52 = vpack.c.bf16 %v2135_v51, %v2134_v49  ;;  %v2136_v53 = vld [vmem:[%s3797_s5 + $0x1e0] sm:$0xff] }
 0x32b   : > { %v3587_v48 = vmax.f32 %v1600_v54, %v1602_v56  ;;  %v2137_v54 = vld [vmem:[%s3797_s5 + $0x1e8] sm:$0xff] }
 0x32c   : > { %v3589_v61 = vmax.f32 %v1601_v58, %v1603_v59  ;;  %v2624_v56 = vpack.c.bf16 %v2137_v54, %v2136_v53  ;;  %v2139_v58 = vld [vmem:[%s3797_s5 + $0x1f8] sm:$0xff] }
 0x32d   : > { %2568 = vmatpush3.bf16.msra.mxu0 %v2567_v57  ;;  %v2138_v57 = vld [vmem:[%s3797_s5 + $0x1f0] sm:$0xff] }
 0x32e   : > { %v1615_v62 = vmax.f32 %v3587_v48, %v3589_v61  ;;  %2569 = vmatprep.subr.bf16.mxu0 %v2840_v12  ;;  %v2627_v59 = vpack.c.bf16 %v2139_v58, %v2138_v57 }
 0x331   : > { %2571 = vmatpush3.bf16.msra.mxu0 %v2570_v50 }
 0x332   : > { %2572 = vmatprep.subr.bf16.mxu0 %v2840_v12 }
 0x335   : > { %2574 = vmatpush3.bf16.msra.mxu0 %v2573_v2 }
 0x336   : > { %2575 = vmatprep.subr.bf16.mxu0 %v2840_v12 }
 0x339   : > { %2577 = vmatpush3.bf16.msra.mxu0 %v2576_v5 }
 0x33a   : > { %2578 = vmatprep.subr.bf16.mxu0 %v2840_v12 }
 0x33d   : > { %2580 = vmatpush3.bf16.msra.mxu0 %v2579_v41 }
 0x33e   : > { %2581 = vmatprep.subr.bf16.mxu0 %v2840_v12 }
 0x340   : > { %2281 = vmatmul.mubr.f32.vlgmr.msra.gmra.mrb[34].mxu0 %v1612_v26  ;;  %v2591_v26 = vpack.c.bf16 %v2115_v23, %v2114_v0 }
 0x341   : > { %2583 = vmatpush3.bf16.msra.mxu0 %v2582_v10  ;;  %2315 = vmatprep.mubr.msk.f32.mxu0 %vm2841_vm6, %v2835_v16 }
 0x342   : > { %2584 = vmatprep.subr.bf16.mxu0 %v2840_v12 }
 0x345   : > { %2586 = vmatpush3.bf16.msra.mxu0 %v2585_v14 }
 0x346   : > { %2587 = vmatprep.subr.bf16.mxu0 %v2840_v12 }
 0x349   : > { %2589 = vmatpush3.bf16.msra.mxu0 %v2588_v18 }
 0x34a   : > { %2590 = vmatprep.subr.bf16.mxu0 %v2840_v12 }
 0x34d   : > { %2592 = vmatpush3.bf16.msra.mxu0 %v2591_v26 }
 0x34e   : > { %2593 = vmatprep.subr.bf16.mxu0 %v2840_v12 }
 0x351   : > { %2595 = vmatpush3.bf16.msra.mxu0 %v2594_v24 }
 0x352   : > { %2596 = vmatprep.subr.bf16.mxu0 %v2840_v12 }
 0x355   : > { %2598 = vmatpush3.bf16.msra.mxu0 %v2597_v29 }
 0x356   : > { %2599 = vmatprep.subr.bf16.mxu0 %v2840_v12 }
 0x359   : > { %2601 = vmatpush3.bf16.msra.mxu0 %v2600_v32 }
 0x35a   : > { %2602 = vmatprep.subr.bf16.mxu0 %v2840_v12 }
 0x35d   : > { %2604 = vmatpush3.bf16.msra.mxu0 %v2603_v35 }
 0x35e   : > { %2605 = vmatprep.subr.bf16.mxu0 %v2840_v12 }
 0x360   : > { %2316 = vmatmul.mubr.f32.vlgmr.msra.gmra.mrb[36].mxu0 %v1614_v39  ;;  %v2132_v39 = vld [vmem:[%s3797_s5 + $0x1c0] sm:$0xff] }
 0x361   : > { %2607 = vmatpush3.bf16.msra.mxu0 %v2606_v38  ;;  %2350 = vmatprep.mubr.msk.f32.mxu0 %vm2841_vm6, %v2835_v16  ;;  %v2131_v16 = vld [vmem:[%s3797_s5 + $0x1b8] sm:$0xff]  ;;  %v2618_v47 = vpack.c.bf16 %v2133_v46, %v2132_v39 }
 0x362   : > { %2608 = vmatprep.subr.bf16.mxu0 %v2840_v12  ;;  %v2615_v43 = vpack.c.bf16 %v2131_v16, %v2130_v44 }
 0x365   : > { %2610 = vmatpush3.bf16.msra.mxu0 %v2609_v45 }
 0x366   : > { %2611 = vmatprep.subr.bf16.mxu0 %v2840_v12 }
 0x369   : > { %2613 = vmatpush3.bf16.msra.mxu0 %v2612_v17 }
 0x36a   : > { %2614 = vmatprep.subr.bf16.mxu0 %v2840_v12 }
 0x36d   : > { %2616 = vmatpush3.bf16.msra.mxu0 %v2615_v43 }
 0x36e   : > { %2617 = vmatprep.subr.bf16.mxu0 %v2840_v12 }
 0x371   : > { %2619 = vmatpush3.bf16.msra.mxu0 %v2618_v47 }
 0x372   : > { %2620 = vmatprep.subr.bf16.mxu0 %v2840_v12 }
 0x375   : > { %2622 = vmatpush3.bf16.msra.mxu0 %v2621_v52 }
 0x376   : > { %2623 = vmatprep.subr.bf16.mxu0 %v2840_v12 }
 0x379   : > { %2625 = vmatpush3.bf16.msra.mxu0 %v2624_v56 }
 0x37a   : > { %2626 = vmatprep.subr.bf16.mxu0 %v2840_v12  ;;  %v2140_v12 = vld [vmem:[%s3798_s6] ss:$0 sm:$0xff] }
 0x37d   : > { %2628 = vmatpush3.bf16.msra.mxu0 %v2627_v59 }
 0x380   : > { %2351 = vmatmul.mubr.f32.vlgmr.msra.gmra.mrb[38].mxu0 %v1615_v62 }
 0x3f3   : > { %v1715_v60 = vpop.f32.mrb[32].mxu0 }
 0x3f4   : > { %v2247_v21 = vpop.f32.mrb[33].mxu0 }
 0x413   : > { %v1785_v50 = vpop.f32.mrb[34].mxu0 }
 0x414   : > { %v1786_v20 = vadd.f32 %v1785_v50, %v1715_v60  ;;  %v2282_v1 = vpop.f32.mrb[35].mxu0 }
 0x433   : > { %v1872_v2 = vpop.f32.mrb[36].mxu0 }
 0x434   : > { %v1876_v3 = vadd.f32 %v1872_v2, %v1786_v20  ;;  %v2317_v4 = vpop.f32.mrb[37].mxu0 }
 0x453   : > { %v1960_v5 = vpop.f32.mrb[38].mxu0 }
 0x454   : > { %v1964_v48 = vadd.f32 %v1960_v5, %v1876_v3  ;;  %v2352_v61 = vpop.f32.mrb[39].mxu0 }
 0x456   : > { %v1972_v62 = vadd.f32 %v2140_v12, %v1964_v48 }
 0x458   : > { %1974 = vst.msk [vmem:[%s385_s19] sm:$0xff] %vm1973_vm7, %v1972_v62 }
 0x459   : > { %2777 = shalt.err (!%p2774_p9)
}
 0x45a   : > { %s2778_s16 = scalar_lea.hbm %s3748_s20, 128  ;;  %s2782_s29 = scalar_lea.hbm %s3799_s7, 256 }
 0x45b   : > { %p2779_p13 = scmp.ne.s32.totalorder %s3748_s20, %s2778_s16  ;;  %p2783_p6 = scmp.lt.u32.totalorder %s3748_s20, %s3799_s7 }
 0x45c   : > { %p2784_p10 = scmp.lt.u32.totalorder %s2782_s29, %s2778_s16  ;;  %p2786_p0 = scmp.lt.u32.totalorder %s2778_s16, %s3748_s20 }
 0x45d   : > { %p2780_p2 = pnand %p2779_p13, %p3821_p12 }
 0x45e   : > { %p2785_p11 = por %p2784_p10, %p2783_p6 }
 0x45f   : > { %p2781_p5 = pneg %p2780_p2 }
 0x460   : > { %p2787_p3 = por %p2786_p0, %p2785_p11 }
 0x462   : > { %p2788_p4 = pnand %p2787_p3, %p2781_p5 }
 0x464   : > { %2791 = shalt.err (!%p2788_p4)
}
 0x465   : > { %2681 = dma.vmem_to_hbm [thread:$0]  (%p3821_p12), %s3750_s18, 128, %s3748_s20, %s1976_s21  }
 0x466 PF: > { %s2001_s11 = sand.u32 1, %s2818_s24   ;;  %p3822_p7 = scmp.ne.s32.totalorder %s3811_s13, 0 }
 0x467   : > { %s2002_s8 = scalar_lea.sflag [#allocation7], %s2001_s11 }
 0x468   : > { %p2688_p8 = pnand %p2069_p1, %p3822_p7 }
 0x46a   : > { %2813 = dma.done.wait (!%p2688_p8), %s2002_s8, 128  }
 0x46b   : > { %2815 = vsyncadd (!%p2688_p8), %s2002_s8, 4294967168  ;;  %p18_p9 = scmp.ge.s32.totalorder %s2908_s30, 4   ;;  %s3823_s24 = smov %s2822_s25 }
 0x46c   : > { %s3824_s25 = smov %s2826_s26  ;;  %s3825_s26 = smov %s2920_s10 }
 0x46d   : > { %s3826_s27 = smov %s2908_s30  ;;  %20 = sbr.rel (!%p18_p9) target bundleno = 4 (0x4), region = 134 }
 0x474   :  { %2007 = vsyncpa [#allocation6], 1 }
 0x475   :  { %2009 = vsyncpa [#allocation6 + $0x1], 1 }
 0x476   :  { %2010 = vsyncpa [#allocation7], 1 }
 0x477   :  { %2012 = vsyncpa [#allocation7 + $0x1], 1 }

</bundles_post_ra>
